<compile_context>
chip_gen: v6e
topology: v6e:2x2x1
jax: 0.10.0
libtpu: 0.0.40
codegen_flags: <defaults>
</compile_context>

<pallas_src>
import functools
import math

import jax
import jax.numpy as jnp
from jax.experimental import pallas as pl
from jax.experimental.pallas import tpu as pltpu

# ---------------- model config (small synthetic BERT, lane-padded) ----------------
VOCAB = 64
MAX_POS = 16
TYPE_VOCAB = 2
HIDDEN = 32                 # true hidden width
HEADS = 2
HEAD_DIM = HIDDEN // HEADS
FFN = 64                    # true FFN width
LAYERS = 2
LN_EPS = 1e-12
# TODO(synk): torch source references self.temperature but never sets it in __init__; use 1.0
TEMPERATURE = 1.0

LANE = 128
DP = 128                    # hidden padded to one full lane group (zero padding)
FP = 128                    # FFN padded to one full lane group
QKV_GROUPS = 3 * HEADS      # column groups: [q_h0, q_h1, k_h0, k_h1, v_h0, v_h1]

_VMEM_SPEC = pl.BlockSpec(memory_space=pltpu.MemorySpace.VMEM)


# ---------------- fused encoder kernel ----------------
def _encoder_kernel(emb_ref, bias_ref, emb_ln_ref,
                    wqkv_ref, bqkv_ref, wo_ref, bo_ref, ln1_ref,
                    w1_ref, b1_ref, w2_ref, b2_ref, ln2_ref,
                    cls_ref, *, nseq, seq_len):
    inv_h = 1.0 / float(HIDDEN)
    scale = 1.0 / math.sqrt(float(HEAD_DIM))

    def layernorm(h, ln):
        # Padded lanes (>= HIDDEN) are exactly zero, so moments over the true
        # HIDDEN width are sum/HIDDEN; gamma/beta are zero-padded, keeping the
        # padded lanes at zero after normalization.
        g = ln[0:1, :]
        b = ln[1:2, :]
        mu = jnp.sum(h, axis=-1, keepdims=True) * inv_h
        var = jnp.sum(h * h, axis=-1, keepdims=True) * inv_h - mu * mu
        return (h - mu) * jax.lax.rsqrt(var + LN_EPS) * g + b

    bias = bias_ref[...]                                  # (M, M) additive attention bias
    h = layernorm(emb_ref[...], emb_ln_ref[...])          # (M, DP) f32, no zeros residual

    for l in range(LAYERS):                               # weights stay resident in VMEM
        # fused QKV projection: one lane-dense MXU matmul for q/k/v of all heads
        qkv = jnp.dot(h.astype(jnp.bfloat16), wqkv_ref[l],
                      preferred_element_type=jnp.float32) + bqkv_ref[l]   # (M, 6*128)

        attn_out = None
        for hh in range(HEADS):                           # H=2, unrolled
            q_h = qkv[:, hh * LANE:(hh + 1) * LANE]                       # (M, 128)
            k_h = qkv[:, (HEADS + hh) * LANE:(HEADS + hh + 1) * LANE]
            v_h = qkv[:, (2 * HEADS + hh) * LANE:(2 * HEADS + hh + 1) * LANE]
            # one batched score matrix over ALL tokens of ALL sequences;
            # bias makes it block-diagonal per sequence + applies padding mask.
            s = jax.lax.dot_general(q_h, k_h, (((1,), (1,)), ((), ())),
                                    preferred_element_type=jnp.float32)   # (M, M)
            s = s * scale + bias
            s = s - jnp.max(s, axis=-1, keepdims=True)
            p = jnp.exp(s)
            p = p * pl.reciprocal(jnp.sum(p, axis=-1, keepdims=True), approx=True)
            ctx_h = jnp.dot(p.astype(jnp.bfloat16), v_h.astype(jnp.bfloat16),
                            preferred_element_type=jnp.float32)           # (M, 128)
            # per-head output projection (rows of Wo for this head, lane padded)
            proj_h = jnp.dot(ctx_h.astype(jnp.bfloat16), wo_ref[l, hh],
                             preferred_element_type=jnp.float32)          # (M, DP)
            attn_out = proj_h if attn_out is None else attn_out + proj_h
        attn_out = attn_out + bo_ref[l]

        h = layernorm(h + attn_out, ln1_ref[l])

        ff = jnp.dot(h.astype(jnp.bfloat16), w1_ref[l],
                     preferred_element_type=jnp.float32) + b1_ref[l]      # (M, FP)
        # TODO(synk): HF BERT default is exact erf GELU; tanh approximation used here.
        ff = jax.nn.gelu(ff, approximate=True)
        ff = jnp.dot(ff.astype(jnp.bfloat16), w2_ref[l],
                     preferred_element_type=jnp.float32) + b2_ref[l]      # (M, DP)

        h = layernorm(h + ff, ln2_ref[l])

    # Fused CLS extraction: token 0 of each sequence.
    for n in range(nseq):
        cls_ref[pl.ds(n, 1), :] = h[n * seq_len:n * seq_len + 1, :]


def _run_encoder(params, emb, bias, nseq, seq_len):
    return pl.pallas_call(
        functools.partial(_encoder_kernel, nseq=nseq, seq_len=seq_len),
        out_shape=jax.ShapeDtypeStruct((nseq, DP), jnp.float32),
        in_specs=[_VMEM_SPEC] * 13,
        out_specs=_VMEM_SPEC,
    )(emb, bias, params["emb_ln"],
      params["wqkv"], params["bqkv"], params["wo"], params["bo"], params["ln1"],
      params["w1"], params["b1"], params["w2"], params["b2"], params["ln2"])


# ---------------- scoring kernel (MXU dots, one call) ----------------
def _score_kernel(q_ref, c_ref, o_ref, *, inv_temp):
    b = q_ref.shape[0]
    q = q_ref[...]                                        # (B, DP)
    for i in range(b):                                    # tiny B, unrolled
        # scores[i, :] = <q[i], ctx[i, c]> / temperature (padded lanes are zero)
        s = jax.lax.dot_general(q[i:i + 1, :], c_ref[i],
                                (((1,), (1,)), ((), ())),
                                preferred_element_type=jnp.float32)       # (1, C)
        o_ref[pl.ds(i, 1), :] = s * inv_temp


def bmm_scores(q_emb, ctx_emb, temperature):
    b, _ = q_emb.shape
    c = ctx_emb.shape[1]
    return pl.pallas_call(
        functools.partial(_score_kernel, inv_temp=float(1.0 / temperature)),
        out_shape=jax.ShapeDtypeStruct((b, c), jnp.float32),
        in_specs=[_VMEM_SPEC, _VMEM_SPEC],
        out_specs=_VMEM_SPEC,
    )(q_emb, ctx_emb)


# ---------------- parameter init (deterministic, synthetic, pre-padded) ----------------
def _init_encoder_params(key):
    def w(k, shape):
        return 0.02 * jax.random.normal(k, shape, dtype=jnp.float32)

    def pad2(a, rows, cols):
        out = jnp.zeros((rows, cols), jnp.float32)
        return out.at[:a.shape[0], :a.shape[1]].set(a)

    def ln_pair():
        gamma = jnp.concatenate([jnp.ones((HIDDEN,), jnp.float32),
                                 jnp.zeros((DP - HIDDEN,), jnp.float32)])
        beta = jnp.zeros((DP,), jnp.float32)
        return jnp.stack([gamma, beta])                   # (2, DP)

    keys = jax.random.split(key, 3 + LAYERS)
    params = {
        # embedding tables pre-padded to DP lanes so gathered embeddings are lane-dense
        "word_emb": pad2(w(keys[0], (VOCAB, HIDDEN)), VOCAB, DP),
        "pos_emb": pad2(w(keys[1], (MAX_POS, HIDDEN)), MAX_POS, DP),
        "type_emb": pad2(w(keys[2], (TYPE_VOCAB, HIDDEN)), TYPE_VOCAB, DP),
        "emb_ln": ln_pair(),
    }

    wqkv_l, bqkv_l, wo_l, bo_l, ln1_l = [], [], [], [], []
    w1_l, b1_l, w2_l, b2_l, ln2_l = [], [], [], [], []
    for l in range(LAYERS):
        lk = jax.random.split(keys[3 + l], 6)
        wq = w(lk[0], (HIDDEN, HIDDEN))
        wk = w(lk[1], (HIDDEN, HIDDEN))
        wv = w(lk[2], (HIDDEN, HIDDEN))
        wo = w(lk[3], (HIDDEN, HIDDEN))
        w1 = w(lk[4], (HIDDEN, FFN))
        w2 = w(lk[5], (FFN, HIDDEN))

        # fused QKV with one 128-lane column group per (tensor, head):
        # groups = [q_h0, q_h1, k_h0, k_h1, v_h0, v_h1]
        wqkv = jnp.zeros((DP, QKV_GROUPS * LANE), jnp.float32)
        for t, wt in enumerate((wq, wk, wv)):
            for hh in range(HEADS):
                g = t * HEADS + hh
                wqkv = wqkv.at[:HIDDEN, g * LANE:g * LANE + HEAD_DIM].set(
                    wt[:, hh * HEAD_DIM:(hh + 1) * HEAD_DIM])
        bqkv = jnp.zeros((1, QKV_GROUPS * LANE), jnp.float32)   # zero bias init

        # per-head output projection, padded to a full lane group on the K side
        wo_h = jnp.zeros((HEADS, LANE, DP), jnp.float32)
        for hh in range(HEADS):
            wo_h = wo_h.at[hh, :HEAD_DIM, :HIDDEN].set(
                wo[hh * HEAD_DIM:(hh + 1) * HEAD_DIM, :])

        wqkv_l.append(wqkv)
        bqkv_l.append(bqkv)
        wo_l.append(wo_h)
        bo_l.append(jnp.zeros((1, DP), jnp.float32))
        ln1_l.append(ln_pair())
        w1_l.append(pad2(w1, DP, FP))
        b1_l.append(jnp.zeros((1, FP), jnp.float32))
        w2_l.append(pad2(w2, FP, DP))
        b2_l.append(jnp.zeros((1, DP), jnp.float32))
        ln2_l.append(ln_pair())

    params.update({
        "wqkv": jnp.stack(wqkv_l).astype(jnp.bfloat16),   # bf16 weights, f32 accumulation
        "bqkv": jnp.stack(bqkv_l),
        "wo": jnp.stack(wo_l).astype(jnp.bfloat16),
        "bo": jnp.stack(bo_l),
        "ln1": jnp.stack(ln1_l),
        "w1": jnp.stack(w1_l).astype(jnp.bfloat16),
        "b1": jnp.stack(b1_l),
        "w2": jnp.stack(w2_l).astype(jnp.bfloat16),
        "b2": jnp.stack(b2_l),
        "ln2": jnp.stack(ln2_l),
    })
    return params


# ---------------- glue: embeddings + attention bias + fused-kernel call ----------------
def _attn_bias(attention_mask):
    """(nseq, S) padding mask -> (M, M) additive bias (block-diagonal per sequence)."""
    nseq, s = attention_mask.shape
    seq_id = jnp.repeat(jnp.arange(nseq), s)              # (M,)
    same = seq_id[:, None] == seq_id[None, :]
    key_pad = (1.0 - attention_mask.reshape(-1).astype(jnp.float32)) * -1e4
    return jnp.where(same, key_pad[None, :], jnp.float32(-1e9))


def bert_encode(params, input_ids, attention_mask, token_type_ids):
    nseq, seq_len = input_ids.shape
    m = nseq * seq_len
    emb = (params["word_emb"][input_ids]
           + params["pos_emb"][jnp.arange(seq_len)][None, :, :]
           + params["type_emb"][token_type_ids]).reshape(m, DP)
    bias = _attn_bias(attention_mask)
    return _run_encoder(params, emb, bias, nseq, seq_len)  # (nseq, DP), CLS embeddings


# ---------------- DragonRetriever forward ----------------
class DragonRetrieverPallas:
    def __init__(self, key):
        kq, kc = jax.random.split(key)
        self.query_params = _init_encoder_params(kq)
        self.context_params = _init_encoder_params(kc)
        self.temperature = TEMPERATURE

    def __call__(self, questions_dict, contexts_dict):
        q_cls = bert_encode(
            self.query_params,
            questions_dict["questions_input_ids"],
            questions_dict["questions_attention_mask"],
            questions_dict["questions_token_type_ids"],
        )
        b = questions_dict["questions_input_ids"].shape[0]
        c = contexts_dict["ctx_input_ids"].shape[1]
        s = contexts_dict["ctx_input_ids"].shape[-1]
        ctx_cls = bert_encode(
            self.context_params,
            contexts_dict["ctx_input_ids"].reshape(-1, s),
            contexts_dict["ctx_attention_mask"].reshape(-1, s),
            contexts_dict["ctx_token_type_ids"].reshape(-1, s),
        )
        ctx_cls = ctx_cls.reshape(b, c, DP)
        # torch.bmm(q.unsqueeze(1), ctx.transpose(1, 2)).squeeze(1) / temperature
        return bmm_scores(q_cls, ctx_cls, self.temperature)


if __name__ == "__main__":
    key = jax.random.PRNGKey(0)
    pkey, dkey = jax.random.split(key)
    model = DragonRetrieverPallas(pkey)

    B, C, S = 2, 2, 8
    k1, k2 = jax.random.split(dkey)
    questions_dict = {
        "questions_input_ids": jax.random.randint(k1, (B, S), 0, VOCAB, dtype=jnp.int32),
        "questions_attention_mask": jnp.ones((B, S), jnp.int32),
        "questions_token_type_ids": jnp.zeros((B, S), jnp.int32),
    }
    contexts_dict = {
        "ctx_input_ids": jax.random.randint(k2, (B, C, S), 0, VOCAB, dtype=jnp.int32),
        "ctx_attention_mask": jnp.ones((B, C, S), jnp.int32),
        "ctx_token_type_ids": jnp.zeros((B, C, S), jnp.int32),
    }

    scores = model(questions_dict, contexts_dict)
    scores = jax.block_until_ready(scores)
    assert scores.shape == (B, C) and scores.dtype == jnp.float32
    assert bool(jnp.all(jnp.isfinite(scores)))
    print("KERNEL_OK")
</pallas_src>

<mosaic_0001>
module attributes {stable_mosaic.version = 11 : i64} {
  func.func @_encoder_kernel(%arg0: memref<16x128xf32, #tpu.memory_space<vmem>>, %arg1: memref<16x16xf32, #tpu.memory_space<vmem>>, %arg2: memref<2x128xf32, #tpu.memory_space<vmem>>, %arg3: memref<2x128x768xbf16, #tpu.memory_space<vmem>>, %arg4: memref<2x1x768xf32, #tpu.memory_space<vmem>>, %arg5: memref<2x2x128x128xbf16, #tpu.memory_space<vmem>>, %arg6: memref<2x1x128xf32, #tpu.memory_space<vmem>>, %arg7: memref<2x2x128xf32, #tpu.memory_space<vmem>>, %arg8: memref<2x128x128xbf16, #tpu.memory_space<vmem>>, %arg9: memref<2x1x128xf32, #tpu.memory_space<vmem>>, %arg10: memref<2x128x128xbf16, #tpu.memory_space<vmem>>, %arg11: memref<2x1x128xf32, #tpu.memory_space<vmem>>, %arg12: memref<2x2x128xf32, #tpu.memory_space<vmem>>, %arg13: memref<2x128xf32, #tpu.memory_space<vmem>>) attributes {dimension_semantics = [], scalar_prefetch = 0 : i64, scratch_operands = 0 : i64, tpu.core_type = #tpu.core_type<tc>} {
    %c0 = arith.constant 0 : index
    %c0_0 = arith.constant 0 : index
    %0 = vector.load %arg1[%c0, %c0_0] : memref<16x16xf32, #tpu.memory_space<vmem>>, vector<16x16xf32>
    %c0_1 = arith.constant 0 : index
    %c0_2 = arith.constant 0 : index
    %1 = vector.load %arg0[%c0_1, %c0_2] : memref<16x128xf32, #tpu.memory_space<vmem>>, vector<16x128xf32>
    %c0_3 = arith.constant 0 : index
    %c0_4 = arith.constant 0 : index
    %2 = vector.load %arg2[%c0_3, %c0_4] : memref<2x128xf32, #tpu.memory_space<vmem>>, vector<2x128xf32>
    %3 = vector.extract_strided_slice %2 {offsets = [0, 0], sizes = [1, 128], strides = [1, 1]} : vector<2x128xf32> to vector<1x128xf32>
    %4 = vector.extract_strided_slice %2 {offsets = [1, 0], sizes = [1, 128], strides = [1, 1]} : vector<2x128xf32> to vector<1x128xf32>
    %cst = arith.constant dense<0.000000e+00> : vector<16xf32>
    %5 = vector.multi_reduction <add>, %1, %cst [1] : vector<16x128xf32> to vector<16xf32>
    %6 = vector.shape_cast %5 : vector<16xf32> to vector<16x1xf32>
    %cst_5 = arith.constant 3.125000e-02 : f32
    %7 = vector.broadcast %cst_5 : f32 to vector<16x1xf32>
    %8 = arith.mulf %6, %7 : vector<16x1xf32>
    %9 = arith.mulf %1, %1 : vector<16x128xf32>
    %cst_6 = arith.constant dense<0.000000e+00> : vector<16xf32>
    %10 = vector.multi_reduction <add>, %9, %cst_6 [1] : vector<16x128xf32> to vector<16xf32>
    %11 = vector.shape_cast %10 : vector<16xf32> to vector<16x1xf32>
    %cst_7 = arith.constant 3.125000e-02 : f32
    %12 = vector.broadcast %cst_7 : f32 to vector<16x1xf32>
    %13 = arith.mulf %11, %12 : vector<16x1xf32>
    %14 = arith.mulf %8, %8 : vector<16x1xf32>
    %15 = arith.subf %13, %14 : vector<16x1xf32>
    %16 = vector.broadcast %8 : vector<16x1xf32> to vector<16x128xf32>
    %17 = arith.subf %1, %16 : vector<16x128xf32>
    %cst_8 = arith.constant 9.99999996E-13 : f32
    %18 = vector.broadcast %cst_8 : f32 to vector<16x1xf32>
    %19 = arith.addf %15, %18 : vector<16x1xf32>
    %20 = math.rsqrt %19 : vector<16x1xf32>
    %21 = vector.broadcast %20 : vector<16x1xf32> to vector<16x128xf32>
    %22 = arith.mulf %17, %21 : vector<16x128xf32>
    %23 = vector.broadcast %3 : vector<1x128xf32> to vector<16x128xf32>
    %24 = arith.mulf %22, %23 : vector<16x128xf32>
    %25 = vector.broadcast %4 : vector<1x128xf32> to vector<16x128xf32>
    %26 = arith.addf %24, %25 : vector<16x128xf32>
    %27 = arith.truncf %26 : vector<16x128xf32> to vector<16x128xbf16>
    %c0_9 = arith.constant 0 : index
    %c0_10 = arith.constant 0 : index
    %c0_11 = arith.constant 0 : index
    %28 = vector.load %arg3[%c0_9, %c0_10, %c0_11] : memref<2x128x768xbf16, #tpu.memory_space<vmem>>, vector<1x128x768xbf16>
    %29 = vector.shape_cast %28 : vector<1x128x768xbf16> to vector<128x768xbf16>
    %cst_12 = arith.constant dense<0.000000e+00> : vector<16x768xf32>
    %30 = tpu.matmul %27, %29, %cst_12 {dimension_numbers = #tpu.dot_dimension_numbers<[1], [0], [0], [1], [0, 0, 1, 1], [], []>} : vector<16x128xbf16>, vector<128x768xbf16>, vector<16x768xf32> -> vector<16x768xf32>
    %c0_13 = arith.constant 0 : index
    %c0_14 = arith.constant 0 : index
    %c0_15 = arith.constant 0 : index
    %31 = vector.load %arg4[%c0_13, %c0_14, %c0_15] : memref<2x1x768xf32, #tpu.memory_space<vmem>>, vector<1x1x768xf32>
    %32 = vector.shape_cast %31 : vector<1x1x768xf32> to vector<1x768xf32>
    %33 = vector.broadcast %32 : vector<1x768xf32> to vector<16x768xf32>
    %34 = arith.addf %30, %33 : vector<16x768xf32>
    %35 = vector.extract_strided_slice %34 {offsets = [0, 0], sizes = [16, 128], strides = [1, 1]} : vector<16x768xf32> to vector<16x128xf32>
    %36 = vector.extract_strided_slice %34 {offsets = [0, 256], sizes = [16, 128], strides = [1, 1]} : vector<16x768xf32> to vector<16x128xf32>
    %37 = vector.extract_strided_slice %34 {offsets = [0, 512], sizes = [16, 128], strides = [1, 1]} : vector<16x768xf32> to vector<16x128xf32>
    %cst_16 = arith.constant dense<0.000000e+00> : vector<16x16xf32>
    %38 = tpu.matmul %35, %36, %cst_16 {dimension_numbers = #tpu.dot_dimension_numbers<[1], [1], [0], [0], [0, 0, 1, 0], [], []>} : vector<16x128xf32>, vector<16x128xf32>, vector<16x16xf32> -> vector<16x16xf32>
    %cst_17 = arith.constant 2.500000e-01 : f32
    %39 = vector.broadcast %cst_17 : f32 to vector<16x16xf32>
    %40 = arith.mulf %38, %39 : vector<16x16xf32>
    %41 = arith.addf %40, %0 : vector<16x16xf32>
    %cst_18 = arith.constant dense<0xFF800000> : vector<16xf32>
    %42 = vector.multi_reduction <maximumf>, %41, %cst_18 [1] : vector<16x16xf32> to vector<16xf32>
    %43 = vector.shape_cast %42 : vector<16xf32> to vector<16x1xf32>
    %44 = vector.broadcast %43 : vector<16x1xf32> to vector<16x16xf32>
    %45 = arith.subf %41, %44 : vector<16x16xf32>
    %46 = math.exp %45 : vector<16x16xf32>
    %cst_19 = arith.constant dense<0.000000e+00> : vector<16xf32>
    %47 = vector.multi_reduction <add>, %46, %cst_19 [1] : vector<16x16xf32> to vector<16xf32>
    %48 = vector.shape_cast %47 : vector<16xf32> to vector<16x1xf32>
    %49 = tpu.reciprocal %48 {approx = true} : vector<16x1xf32> -> vector<16x1xf32>
    %50 = vector.broadcast %49 : vector<16x1xf32> to vector<16x16xf32>
    %51 = arith.mulf %46, %50 : vector<16x16xf32>
    %52 = arith.truncf %51 : vector<16x16xf32> to vector<16x16xbf16>
    %53 = arith.truncf %37 : vector<16x128xf32> to vector<16x128xbf16>
    %cst_20 = arith.constant dense<0.000000e+00> : vector<16x128xf32>
    %54 = tpu.matmul %52, %53, %cst_20 {dimension_numbers = #tpu.dot_dimension_numbers<[1], [0], [0], [1], [0, 0, 1, 1], [], []>} : vector<16x16xbf16>, vector<16x128xbf16>, vector<16x128xf32> -> vector<16x128xf32>
    %55 = arith.truncf %54 : vector<16x128xf32> to vector<16x128xbf16>
    %c0_21 = arith.constant 0 : index
    %c0_22 = arith.constant 0 : index
    %c0_23 = arith.constant 0 : index
    %c0_24 = arith.constant 0 : index
    %56 = vector.load %arg5[%c0_21, %c0_22, %c0_23, %c0_24] : memref<2x2x128x128xbf16, #tpu.memory_space<vmem>>, vector<1x1x128x128xbf16>
    %57 = vector.shape_cast %56 : vector<1x1x128x128xbf16> to vector<128x128xbf16>
    %cst_25 = arith.constant dense<0.000000e+00> : vector<16x128xf32>
    %58 = tpu.matmul %55, %57, %cst_25 {dimension_numbers = #tpu.dot_dimension_numbers<[1], [0], [0], [1], [0, 0, 1, 1], [], []>} : vector<16x128xbf16>, vector<128x128xbf16>, vector<16x128xf32> -> vector<16x128xf32>
    %59 = vector.extract_strided_slice %34 {offsets = [0, 128], sizes = [16, 128], strides = [1, 1]} : vector<16x768xf32> to vector<16x128xf32>
    %60 = vector.extract_strided_slice %34 {offsets = [0, 384], sizes = [16, 128], strides = [1, 1]} : vector<16x768xf32> to vector<16x128xf32>
    %61 = vector.extract_strided_slice %34 {offsets = [0, 640], sizes = [16, 128], strides = [1, 1]} : vector<16x768xf32> to vector<16x128xf32>
    %cst_26 = arith.constant dense<0.000000e+00> : vector<16x16xf32>
    %62 = tpu.matmul %59, %60, %cst_26 {dimension_numbers = #tpu.dot_dimension_numbers<[1], [1], [0], [0], [0, 0, 1, 0], [], []>} : vector<16x128xf32>, vector<16x128xf32>, vector<16x16xf32> -> vector<16x16xf32>
    %cst_27 = arith.constant 2.500000e-01 : f32
    %63 = vector.broadcast %cst_27 : f32 to vector<16x16xf32>
    %64 = arith.mulf %62, %63 : vector<16x16xf32>
    %65 = arith.addf %64, %0 : vector<16x16xf32>
    %cst_28 = arith.constant dense<0xFF800000> : vector<16xf32>
    %66 = vector.multi_reduction <maximumf>, %65, %cst_28 [1] : vector<16x16xf32> to vector<16xf32>
    %67 = vector.shape_cast %66 : vector<16xf32> to vector<16x1xf32>
    %68 = vector.broadcast %67 : vector<16x1xf32> to vector<16x16xf32>
    %69 = arith.subf %65, %68 : vector<16x16xf32>
    %70 = math.exp %69 : vector<16x16xf32>
    %cst_29 = arith.constant dense<0.000000e+00> : vector<16xf32>
    %71 = vector.multi_reduction <add>, %70, %cst_29 [1] : vector<16x16xf32> to vector<16xf32>
    %72 = vector.shape_cast %71 : vector<16xf32> to vector<16x1xf32>
    %73 = tpu.reciprocal %72 {approx = true} : vector<16x1xf32> -> vector<16x1xf32>
    %74 = vector.broadcast %73 : vector<16x1xf32> to vector<16x16xf32>
    %75 = arith.mulf %70, %74 : vector<16x16xf32>
    %76 = arith.truncf %75 : vector<16x16xf32> to vector<16x16xbf16>
    %77 = arith.truncf %61 : vector<16x128xf32> to vector<16x128xbf16>
    %cst_30 = arith.constant dense<0.000000e+00> : vector<16x128xf32>
    %78 = tpu.matmul %76, %77, %cst_30 {dimension_numbers = #tpu.dot_dimension_numbers<[1], [0], [0], [1], [0, 0, 1, 1], [], []>} : vector<16x16xbf16>, vector<16x128xbf16>, vector<16x128xf32> -> vector<16x128xf32>
    %79 = arith.truncf %78 : vector<16x128xf32> to vector<16x128xbf16>
    %c0_31 = arith.constant 0 : index
    %c1 = arith.constant 1 : index
    %c0_32 = arith.constant 0 : index
    %c0_33 = arith.constant 0 : index
    %80 = vector.load %arg5[%c0_31, %c1, %c0_32, %c0_33] : memref<2x2x128x128xbf16, #tpu.memory_space<vmem>>, vector<1x1x128x128xbf16>
    %81 = vector.shape_cast %80 : vector<1x1x128x128xbf16> to vector<128x128xbf16>
    %cst_34 = arith.constant dense<0.000000e+00> : vector<16x128xf32>
    %82 = tpu.matmul %79, %81, %cst_34 {dimension_numbers = #tpu.dot_dimension_numbers<[1], [0], [0], [1], [0, 0, 1, 1], [], []>} : vector<16x128xbf16>, vector<128x128xbf16>, vector<16x128xf32> -> vector<16x128xf32>
    %83 = arith.addf %58, %82 : vector<16x128xf32>
    %c0_35 = arith.constant 0 : index
    %c0_36 = arith.constant 0 : index
    %c0_37 = arith.constant 0 : index
    %84 = vector.load %arg6[%c0_35, %c0_36, %c0_37] : memref<2x1x128xf32, #tpu.memory_space<vmem>>, vector<1x1x128xf32>
    %85 = vector.shape_cast %84 : vector<1x1x128xf32> to vector<1x128xf32>
    %86 = vector.broadcast %85 : vector<1x128xf32> to vector<16x128xf32>
    %87 = arith.addf %83, %86 : vector<16x128xf32>
    %88 = arith.addf %26, %87 : vector<16x128xf32>
    %c0_38 = arith.constant 0 : index
    %c0_39 = arith.constant 0 : index
    %c0_40 = arith.constant 0 : index
    %89 = vector.load %arg7[%c0_38, %c0_39, %c0_40] : memref<2x2x128xf32, #tpu.memory_space<vmem>>, vector<1x2x128xf32>
    %90 = vector.shape_cast %89 : vector<1x2x128xf32> to vector<2x128xf32>
    %91 = vector.extract_strided_slice %90 {offsets = [0, 0], sizes = [1, 128], strides = [1, 1]} : vector<2x128xf32> to vector<1x128xf32>
    %92 = vector.extract_strided_slice %90 {offsets = [1, 0], sizes = [1, 128], strides = [1, 1]} : vector<2x128xf32> to vector<1x128xf32>
    %cst_41 = arith.constant dense<0.000000e+00> : vector<16xf32>
    %93 = vector.multi_reduction <add>, %88, %cst_41 [1] : vector<16x128xf32> to vector<16xf32>
    %94 = vector.shape_cast %93 : vector<16xf32> to vector<16x1xf32>
    %cst_42 = arith.constant 3.125000e-02 : f32
    %95 = vector.broadcast %cst_42 : f32 to vector<16x1xf32>
    %96 = arith.mulf %94, %95 : vector<16x1xf32>
    %97 = arith.mulf %88, %88 : vector<16x128xf32>
    %cst_43 = arith.constant dense<0.000000e+00> : vector<16xf32>
    %98 = vector.multi_reduction <add>, %97, %cst_43 [1] : vector<16x128xf32> to vector<16xf32>
    %99 = vector.shape_cast %98 : vector<16xf32> to vector<16x1xf32>
    %cst_44 = arith.constant 3.125000e-02 : f32
    %100 = vector.broadcast %cst_44 : f32 to vector<16x1xf32>
    %101 = arith.mulf %99, %100 : vector<16x1xf32>
    %102 = arith.mulf %96, %96 : vector<16x1xf32>
    %103 = arith.subf %101, %102 : vector<16x1xf32>
    %104 = vector.broadcast %96 : vector<16x1xf32> to vector<16x128xf32>
    %105 = arith.subf %88, %104 : vector<16x128xf32>
    %cst_45 = arith.constant 9.99999996E-13 : f32
    %106 = vector.broadcast %cst_45 : f32 to vector<16x1xf32>
    %107 = arith.addf %103, %106 : vector<16x1xf32>
    %108 = math.rsqrt %107 : vector<16x1xf32>
    %109 = vector.broadcast %108 : vector<16x1xf32> to vector<16x128xf32>
    %110 = arith.mulf %105, %109 : vector<16x128xf32>
    %111 = vector.broadcast %91 : vector<1x128xf32> to vector<16x128xf32>
    %112 = arith.mulf %110, %111 : vector<16x128xf32>
    %113 = vector.broadcast %92 : vector<1x128xf32> to vector<16x128xf32>
    %114 = arith.addf %112, %113 : vector<16x128xf32>
    %115 = arith.truncf %114 : vector<16x128xf32> to vector<16x128xbf16>
    %c0_46 = arith.constant 0 : index
    %c0_47 = arith.constant 0 : index
    %c0_48 = arith.constant 0 : index
    %116 = vector.load %arg8[%c0_46, %c0_47, %c0_48] : memref<2x128x128xbf16, #tpu.memory_space<vmem>>, vector<1x128x128xbf16>
    %117 = vector.shape_cast %116 : vector<1x128x128xbf16> to vector<128x128xbf16>
    %cst_49 = arith.constant dense<0.000000e+00> : vector<16x128xf32>
    %118 = tpu.matmul %115, %117, %cst_49 {dimension_numbers = #tpu.dot_dimension_numbers<[1], [0], [0], [1], [0, 0, 1, 1], [], []>} : vector<16x128xbf16>, vector<128x128xbf16>, vector<16x128xf32> -> vector<16x128xf32>
    %c0_50 = arith.constant 0 : index
    %c0_51 = arith.constant 0 : index
    %c0_52 = arith.constant 0 : index
    %119 = vector.load %arg9[%c0_50, %c0_51, %c0_52] : memref<2x1x128xf32, #tpu.memory_space<vmem>>, vector<1x1x128xf32>
    %120 = vector.shape_cast %119 : vector<1x1x128xf32> to vector<1x128xf32>
    %121 = vector.broadcast %120 : vector<1x128xf32> to vector<16x128xf32>
    %122 = arith.addf %118, %121 : vector<16x128xf32>
    %123 = arith.mulf %122, %122 : vector<16x128xf32>
    %124 = arith.mulf %122, %123 : vector<16x128xf32>
    %cst_53 = arith.constant 4.471500e-02 : f32
    %125 = vector.broadcast %cst_53 : f32 to vector<16x128xf32>
    %126 = arith.mulf %125, %124 : vector<16x128xf32>
    %127 = arith.addf %122, %126 : vector<16x128xf32>
    %cst_54 = arith.constant 0.797884583 : f32
    %128 = vector.broadcast %cst_54 : f32 to vector<16x128xf32>
    %129 = arith.mulf %128, %127 : vector<16x128xf32>
    %130 = math.tanh %129 : vector<16x128xf32>
    %cst_55 = arith.constant 1.000000e+00 : f32
    %131 = vector.broadcast %cst_55 : f32 to vector<16x128xf32>
    %132 = arith.addf %131, %130 : vector<16x128xf32>
    %cst_56 = arith.constant 5.000000e-01 : f32
    %133 = vector.broadcast %cst_56 : f32 to vector<16x128xf32>
    %134 = arith.mulf %133, %132 : vector<16x128xf32>
    %135 = arith.mulf %122, %134 : vector<16x128xf32>
    %136 = arith.truncf %135 : vector<16x128xf32> to vector<16x128xbf16>
    %c0_57 = arith.constant 0 : index
    %c0_58 = arith.constant 0 : index
    %c0_59 = arith.constant 0 : index
    %137 = vector.load %arg10[%c0_57, %c0_58, %c0_59] : memref<2x128x128xbf16, #tpu.memory_space<vmem>>, vector<1x128x128xbf16>
    %138 = vector.shape_cast %137 : vector<1x128x128xbf16> to vector<128x128xbf16>
    %cst_60 = arith.constant dense<0.000000e+00> : vector<16x128xf32>
    %139 = tpu.matmul %136, %138, %cst_60 {dimension_numbers = #tpu.dot_dimension_numbers<[1], [0], [0], [1], [0, 0, 1, 1], [], []>} : vector<16x128xbf16>, vector<128x128xbf16>, vector<16x128xf32> -> vector<16x128xf32>
    %c0_61 = arith.constant 0 : index
    %c0_62 = arith.constant 0 : index
    %c0_63 = arith.constant 0 : index
    %140 = vector.load %arg11[%c0_61, %c0_62, %c0_63] : memref<2x1x128xf32, #tpu.memory_space<vmem>>, vector<1x1x128xf32>
    %141 = vector.shape_cast %140 : vector<1x1x128xf32> to vector<1x128xf32>
    %142 = vector.broadcast %141 : vector<1x128xf32> to vector<16x128xf32>
    %143 = arith.addf %139, %142 : vector<16x128xf32>
    %144 = arith.addf %114, %143 : vector<16x128xf32>
    %c0_64 = arith.constant 0 : index
    %c0_65 = arith.constant 0 : index
    %c0_66 = arith.constant 0 : index
    %145 = vector.load %arg12[%c0_64, %c0_65, %c0_66] : memref<2x2x128xf32, #tpu.memory_space<vmem>>, vector<1x2x128xf32>
    %146 = vector.shape_cast %145 : vector<1x2x128xf32> to vector<2x128xf32>
    %147 = vector.extract_strided_slice %146 {offsets = [0, 0], sizes = [1, 128], strides = [1, 1]} : vector<2x128xf32> to vector<1x128xf32>
    %148 = vector.extract_strided_slice %146 {offsets = [1, 0], sizes = [1, 128], strides = [1, 1]} : vector<2x128xf32> to vector<1x128xf32>
    %cst_67 = arith.constant dense<0.000000e+00> : vector<16xf32>
    %149 = vector.multi_reduction <add>, %144, %cst_67 [1] : vector<16x128xf32> to vector<16xf32>
    %150 = vector.shape_cast %149 : vector<16xf32> to vector<16x1xf32>
    %cst_68 = arith.constant 3.125000e-02 : f32
    %151 = vector.broadcast %cst_68 : f32 to vector<16x1xf32>
    %152 = arith.mulf %150, %151 : vector<16x1xf32>
    %153 = arith.mulf %144, %144 : vector<16x128xf32>
    %cst_69 = arith.constant dense<0.000000e+00> : vector<16xf32>
    %154 = vector.multi_reduction <add>, %153, %cst_69 [1] : vector<16x128xf32> to vector<16xf32>
    %155 = vector.shape_cast %154 : vector<16xf32> to vector<16x1xf32>
    %cst_70 = arith.constant 3.125000e-02 : f32
    %156 = vector.broadcast %cst_70 : f32 to vector<16x1xf32>
    %157 = arith.mulf %155, %156 : vector<16x1xf32>
    %158 = arith.mulf %152, %152 : vector<16x1xf32>
    %159 = arith.subf %157, %158 : vector<16x1xf32>
    %160 = vector.broadcast %152 : vector<16x1xf32> to vector<16x128xf32>
    %161 = arith.subf %144, %160 : vector<16x128xf32>
    %cst_71 = arith.constant 9.99999996E-13 : f32
    %162 = vector.broadcast %cst_71 : f32 to vector<16x1xf32>
    %163 = arith.addf %159, %162 : vector<16x1xf32>
    %164 = math.rsqrt %163 : vector<16x1xf32>
    %165 = vector.broadcast %164 : vector<16x1xf32> to vector<16x128xf32>
    %166 = arith.mulf %161, %165 : vector<16x128xf32>
    %167 = vector.broadcast %147 : vector<1x128xf32> to vector<16x128xf32>
    %168 = arith.mulf %166, %167 : vector<16x128xf32>
    %169 = vector.broadcast %148 : vector<1x128xf32> to vector<16x128xf32>
    %170 = arith.addf %168, %169 : vector<16x128xf32>
    %171 = arith.truncf %170 : vector<16x128xf32> to vector<16x128xbf16>
    %c1_72 = arith.constant 1 : index
    %c0_73 = arith.constant 0 : index
    %c0_74 = arith.constant 0 : index
    %172 = vector.load %arg3[%c1_72, %c0_73, %c0_74] : memref<2x128x768xbf16, #tpu.memory_space<vmem>>, vector<1x128x768xbf16>
    %173 = vector.shape_cast %172 : vector<1x128x768xbf16> to vector<128x768xbf16>
    %cst_75 = arith.constant dense<0.000000e+00> : vector<16x768xf32>
    %174 = tpu.matmul %171, %173, %cst_75 {dimension_numbers = #tpu.dot_dimension_numbers<[1], [0], [0], [1], [0, 0, 1, 1], [], []>} : vector<16x128xbf16>, vector<128x768xbf16>, vector<16x768xf32> -> vector<16x768xf32>
    %c1_76 = arith.constant 1 : index
    %c0_77 = arith.constant 0 : index
    %c0_78 = arith.constant 0 : index
    %175 = vector.load %arg4[%c1_76, %c0_77, %c0_78] : memref<2x1x768xf32, #tpu.memory_space<vmem>>, vector<1x1x768xf32>
    %176 = vector.shape_cast %175 : vector<1x1x768xf32> to vector<1x768xf32>
    %177 = vector.broadcast %176 : vector<1x768xf32> to vector<16x768xf32>
    %178 = arith.addf %174, %177 : vector<16x768xf32>
    %179 = vector.extract_strided_slice %178 {offsets = [0, 0], sizes = [16, 128], strides = [1, 1]} : vector<16x768xf32> to vector<16x128xf32>
    %180 = vector.extract_strided_slice %178 {offsets = [0, 256], sizes = [16, 128], strides = [1, 1]} : vector<16x768xf32> to vector<16x128xf32>
    %181 = vector.extract_strided_slice %178 {offsets = [0, 512], sizes = [16, 128], strides = [1, 1]} : vector<16x768xf32> to vector<16x128xf32>
    %cst_79 = arith.constant dense<0.000000e+00> : vector<16x16xf32>
    %182 = tpu.matmul %179, %180, %cst_79 {dimension_numbers = #tpu.dot_dimension_numbers<[1], [1], [0], [0], [0, 0, 1, 0], [], []>} : vector<16x128xf32>, vector<16x128xf32>, vector<16x16xf32> -> vector<16x16xf32>
    %cst_80 = arith.constant 2.500000e-01 : f32
    %183 = vector.broadcast %cst_80 : f32 to vector<16x16xf32>
    %184 = arith.mulf %182, %183 : vector<16x16xf32>
    %185 = arith.addf %184, %0 : vector<16x16xf32>
    %cst_81 = arith.constant dense<0xFF800000> : vector<16xf32>
    %186 = vector.multi_reduction <maximumf>, %185, %cst_81 [1] : vector<16x16xf32> to vector<16xf32>
    %187 = vector.shape_cast %186 : vector<16xf32> to vector<16x1xf32>
    %188 = vector.broadcast %187 : vector<16x1xf32> to vector<16x16xf32>
    %189 = arith.subf %185, %188 : vector<16x16xf32>
    %190 = math.exp %189 : vector<16x16xf32>
    %cst_82 = arith.constant dense<0.000000e+00> : vector<16xf32>
    %191 = vector.multi_reduction <add>, %190, %cst_82 [1] : vector<16x16xf32> to vector<16xf32>
    %192 = vector.shape_cast %191 : vector<16xf32> to vector<16x1xf32>
    %193 = tpu.reciprocal %192 {approx = true} : vector<16x1xf32> -> vector<16x1xf32>
    %194 = vector.broadcast %193 : vector<16x1xf32> to vector<16x16xf32>
    %195 = arith.mulf %190, %194 : vector<16x16xf32>
    %196 = arith.truncf %195 : vector<16x16xf32> to vector<16x16xbf16>
    %197 = arith.truncf %181 : vector<16x128xf32> to vector<16x128xbf16>
    %cst_83 = arith.constant dense<0.000000e+00> : vector<16x128xf32>
    %198 = tpu.matmul %196, %197, %cst_83 {dimension_numbers = #tpu.dot_dimension_numbers<[1], [0], [0], [1], [0, 0, 1, 1], [], []>} : vector<16x16xbf16>, vector<16x128xbf16>, vector<16x128xf32> -> vector<16x128xf32>
    %199 = arith.truncf %198 : vector<16x128xf32> to vector<16x128xbf16>
    %c1_84 = arith.constant 1 : index
    %c0_85 = arith.constant 0 : index
    %c0_86 = arith.constant 0 : index
    %c0_87 = arith.constant 0 : index
    %200 = vector.load %arg5[%c1_84, %c0_85, %c0_86, %c0_87] : memref<2x2x128x128xbf16, #tpu.memory_space<vmem>>, vector<1x1x128x128xbf16>
    %201 = vector.shape_cast %200 : vector<1x1x128x128xbf16> to vector<128x128xbf16>
    %cst_88 = arith.constant dense<0.000000e+00> : vector<16x128xf32>
    %202 = tpu.matmul %199, %201, %cst_88 {dimension_numbers = #tpu.dot_dimension_numbers<[1], [0], [0], [1], [0, 0, 1, 1], [], []>} : vector<16x128xbf16>, vector<128x128xbf16>, vector<16x128xf32> -> vector<16x128xf32>
    %203 = vector.extract_strided_slice %178 {offsets = [0, 128], sizes = [16, 128], strides = [1, 1]} : vector<16x768xf32> to vector<16x128xf32>
    %204 = vector.extract_strided_slice %178 {offsets = [0, 384], sizes = [16, 128], strides = [1, 1]} : vector<16x768xf32> to vector<16x128xf32>
    %205 = vector.extract_strided_slice %178 {offsets = [0, 640], sizes = [16, 128], strides = [1, 1]} : vector<16x768xf32> to vector<16x128xf32>
    %cst_89 = arith.constant dense<0.000000e+00> : vector<16x16xf32>
    %206 = tpu.matmul %203, %204, %cst_89 {dimension_numbers = #tpu.dot_dimension_numbers<[1], [1], [0], [0], [0, 0, 1, 0], [], []>} : vector<16x128xf32>, vector<16x128xf32>, vector<16x16xf32> -> vector<16x16xf32>
    %cst_90 = arith.constant 2.500000e-01 : f32
    %207 = vector.broadcast %cst_90 : f32 to vector<16x16xf32>
    %208 = arith.mulf %206, %207 : vector<16x16xf32>
    %209 = arith.addf %208, %0 : vector<16x16xf32>
    %cst_91 = arith.constant dense<0xFF800000> : vector<16xf32>
    %210 = vector.multi_reduction <maximumf>, %209, %cst_91 [1] : vector<16x16xf32> to vector<16xf32>
    %211 = vector.shape_cast %210 : vector<16xf32> to vector<16x1xf32>
    %212 = vector.broadcast %211 : vector<16x1xf32> to vector<16x16xf32>
    %213 = arith.subf %209, %212 : vector<16x16xf32>
    %214 = math.exp %213 : vector<16x16xf32>
    %cst_92 = arith.constant dense<0.000000e+00> : vector<16xf32>
    %215 = vector.multi_reduction <add>, %214, %cst_92 [1] : vector<16x16xf32> to vector<16xf32>
    %216 = vector.shape_cast %215 : vector<16xf32> to vector<16x1xf32>
    %217 = tpu.reciprocal %216 {approx = true} : vector<16x1xf32> -> vector<16x1xf32>
    %218 = vector.broadcast %217 : vector<16x1xf32> to vector<16x16xf32>
    %219 = arith.mulf %214, %218 : vector<16x16xf32>
    %220 = arith.truncf %219 : vector<16x16xf32> to vector<16x16xbf16>
    %221 = arith.truncf %205 : vector<16x128xf32> to vector<16x128xbf16>
    %cst_93 = arith.constant dense<0.000000e+00> : vector<16x128xf32>
    %222 = tpu.matmul %220, %221, %cst_93 {dimension_numbers = #tpu.dot_dimension_numbers<[1], [0], [0], [1], [0, 0, 1, 1], [], []>} : vector<16x16xbf16>, vector<16x128xbf16>, vector<16x128xf32> -> vector<16x128xf32>
    %223 = arith.truncf %222 : vector<16x128xf32> to vector<16x128xbf16>
    %c1_94 = arith.constant 1 : index
    %c1_95 = arith.constant 1 : index
    %c0_96 = arith.constant 0 : index
    %c0_97 = arith.constant 0 : index
    %224 = vector.load %arg5[%c1_94, %c1_95, %c0_96, %c0_97] : memref<2x2x128x128xbf16, #tpu.memory_space<vmem>>, vector<1x1x128x128xbf16>
    %225 = vector.shape_cast %224 : vector<1x1x128x128xbf16> to vector<128x128xbf16>
    %cst_98 = arith.constant dense<0.000000e+00> : vector<16x128xf32>
    %226 = tpu.matmul %223, %225, %cst_98 {dimension_numbers = #tpu.dot_dimension_numbers<[1], [0], [0], [1], [0, 0, 1, 1], [], []>} : vector<16x128xbf16>, vector<128x128xbf16>, vector<16x128xf32> -> vector<16x128xf32>
    %227 = arith.addf %202, %226 : vector<16x128xf32>
    %c1_99 = arith.constant 1 : index
    %c0_100 = arith.constant 0 : index
    %c0_101 = arith.constant 0 : index
    %228 = vector.load %arg6[%c1_99, %c0_100, %c0_101] : memref<2x1x128xf32, #tpu.memory_space<vmem>>, vector<1x1x128xf32>
    %229 = vector.shape_cast %228 : vector<1x1x128xf32> to vector<1x128xf32>
    %230 = vector.broadcast %229 : vector<1x128xf32> to vector<16x128xf32>
    %231 = arith.addf %227, %230 : vector<16x128xf32>
    %232 = arith.addf %170, %231 : vector<16x128xf32>
    %c1_102 = arith.constant 1 : index
    %c0_103 = arith.constant 0 : index
    %c0_104 = arith.constant 0 : index
    %233 = vector.load %arg7[%c1_102, %c0_103, %c0_104] : memref<2x2x128xf32, #tpu.memory_space<vmem>>, vector<1x2x128xf32>
    %234 = vector.shape_cast %233 : vector<1x2x128xf32> to vector<2x128xf32>
    %235 = vector.extract_strided_slice %234 {offsets = [0, 0], sizes = [1, 128], strides = [1, 1]} : vector<2x128xf32> to vector<1x128xf32>
    %236 = vector.extract_strided_slice %234 {offsets = [1, 0], sizes = [1, 128], strides = [1, 1]} : vector<2x128xf32> to vector<1x128xf32>
    %cst_105 = arith.constant dense<0.000000e+00> : vector<16xf32>
    %237 = vector.multi_reduction <add>, %232, %cst_105 [1] : vector<16x128xf32> to vector<16xf32>
    %238 = vector.shape_cast %237 : vector<16xf32> to vector<16x1xf32>
    %cst_106 = arith.constant 3.125000e-02 : f32
    %239 = vector.broadcast %cst_106 : f32 to vector<16x1xf32>
    %240 = arith.mulf %238, %239 : vector<16x1xf32>
    %241 = arith.mulf %232, %232 : vector<16x128xf32>
    %cst_107 = arith.constant dense<0.000000e+00> : vector<16xf32>
    %242 = vector.multi_reduction <add>, %241, %cst_107 [1] : vector<16x128xf32> to vector<16xf32>
    %243 = vector.shape_cast %242 : vector<16xf32> to vector<16x1xf32>
    %cst_108 = arith.constant 3.125000e-02 : f32
    %244 = vector.broadcast %cst_108 : f32 to vector<16x1xf32>
    %245 = arith.mulf %243, %244 : vector<16x1xf32>
    %246 = arith.mulf %240, %240 : vector<16x1xf32>
    %247 = arith.subf %245, %246 : vector<16x1xf32>
    %248 = vector.broadcast %240 : vector<16x1xf32> to vector<16x128xf32>
    %249 = arith.subf %232, %248 : vector<16x128xf32>
    %cst_109 = arith.constant 9.99999996E-13 : f32
    %250 = vector.broadcast %cst_109 : f32 to vector<16x1xf32>
    %251 = arith.addf %247, %250 : vector<16x1xf32>
    %252 = math.rsqrt %251 : vector<16x1xf32>
    %253 = vector.broadcast %252 : vector<16x1xf32> to vector<16x128xf32>
    %254 = arith.mulf %249, %253 : vector<16x128xf32>
    %255 = vector.broadcast %235 : vector<1x128xf32> to vector<16x128xf32>
    %256 = arith.mulf %254, %255 : vector<16x128xf32>
    %257 = vector.broadcast %236 : vector<1x128xf32> to vector<16x128xf32>
    %258 = arith.addf %256, %257 : vector<16x128xf32>
    %259 = arith.truncf %258 : vector<16x128xf32> to vector<16x128xbf16>
    %c1_110 = arith.constant 1 : index
    %c0_111 = arith.constant 0 : index
    %c0_112 = arith.constant 0 : index
    %260 = vector.load %arg8[%c1_110, %c0_111, %c0_112] : memref<2x128x128xbf16, #tpu.memory_space<vmem>>, vector<1x128x128xbf16>
    %261 = vector.shape_cast %260 : vector<1x128x128xbf16> to vector<128x128xbf16>
    %cst_113 = arith.constant dense<0.000000e+00> : vector<16x128xf32>
    %262 = tpu.matmul %259, %261, %cst_113 {dimension_numbers = #tpu.dot_dimension_numbers<[1], [0], [0], [1], [0, 0, 1, 1], [], []>} : vector<16x128xbf16>, vector<128x128xbf16>, vector<16x128xf32> -> vector<16x128xf32>
    %c1_114 = arith.constant 1 : index
    %c0_115 = arith.constant 0 : index
    %c0_116 = arith.constant 0 : index
    %263 = vector.load %arg9[%c1_114, %c0_115, %c0_116] : memref<2x1x128xf32, #tpu.memory_space<vmem>>, vector<1x1x128xf32>
    %264 = vector.shape_cast %263 : vector<1x1x128xf32> to vector<1x128xf32>
    %265 = vector.broadcast %264 : vector<1x128xf32> to vector<16x128xf32>
    %266 = arith.addf %262, %265 : vector<16x128xf32>
    %267 = arith.mulf %266, %266 : vector<16x128xf32>
    %268 = arith.mulf %266, %267 : vector<16x128xf32>
    %cst_117 = arith.constant 4.471500e-02 : f32
    %269 = vector.broadcast %cst_117 : f32 to vector<16x128xf32>
    %270 = arith.mulf %269, %268 : vector<16x128xf32>
    %271 = arith.addf %266, %270 : vector<16x128xf32>
    %cst_118 = arith.constant 0.797884583 : f32
    %272 = vector.broadcast %cst_118 : f32 to vector<16x128xf32>
    %273 = arith.mulf %272, %271 : vector<16x128xf32>
    %274 = math.tanh %273 : vector<16x128xf32>
    %cst_119 = arith.constant 1.000000e+00 : f32
    %275 = vector.broadcast %cst_119 : f32 to vector<16x128xf32>
    %276 = arith.addf %275, %274 : vector<16x128xf32>
    %cst_120 = arith.constant 5.000000e-01 : f32
    %277 = vector.broadcast %cst_120 : f32 to vector<16x128xf32>
    %278 = arith.mulf %277, %276 : vector<16x128xf32>
    %279 = arith.mulf %266, %278 : vector<16x128xf32>
    %280 = arith.truncf %279 : vector<16x128xf32> to vector<16x128xbf16>
    %c1_121 = arith.constant 1 : index
    %c0_122 = arith.constant 0 : index
    %c0_123 = arith.constant 0 : index
    %281 = vector.load %arg10[%c1_121, %c0_122, %c0_123] : memref<2x128x128xbf16, #tpu.memory_space<vmem>>, vector<1x128x128xbf16>
    %282 = vector.shape_cast %281 : vector<1x128x128xbf16> to vector<128x128xbf16>
    %cst_124 = arith.constant dense<0.000000e+00> : vector<16x128xf32>
    %283 = tpu.matmul %280, %282, %cst_124 {dimension_numbers = #tpu.dot_dimension_numbers<[1], [0], [0], [1], [0, 0, 1, 1], [], []>} : vector<16x128xbf16>, vector<128x128xbf16>, vector<16x128xf32> -> vector<16x128xf32>
    %c1_125 = arith.constant 1 : index
    %c0_126 = arith.constant 0 : index
    %c0_127 = arith.constant 0 : index
    %284 = vector.load %arg11[%c1_125, %c0_126, %c0_127] : memref<2x1x128xf32, #tpu.memory_space<vmem>>, vector<1x1x128xf32>
    %285 = vector.shape_cast %284 : vector<1x1x128xf32> to vector<1x128xf32>
    %286 = vector.broadcast %285 : vector<1x128xf32> to vector<16x128xf32>
    %287 = arith.addf %283, %286 : vector<16x128xf32>
    %288 = arith.addf %258, %287 : vector<16x128xf32>
    %c1_128 = arith.constant 1 : index
    %c0_129 = arith.constant 0 : index
    %c0_130 = arith.constant 0 : index
    %289 = vector.load %arg12[%c1_128, %c0_129, %c0_130] : memref<2x2x128xf32, #tpu.memory_space<vmem>>, vector<1x2x128xf32>
    %290 = vector.shape_cast %289 : vector<1x2x128xf32> to vector<2x128xf32>
    %291 = vector.extract_strided_slice %290 {offsets = [0, 0], sizes = [1, 128], strides = [1, 1]} : vector<2x128xf32> to vector<1x128xf32>
    %292 = vector.extract_strided_slice %290 {offsets = [1, 0], sizes = [1, 128], strides = [1, 1]} : vector<2x128xf32> to vector<1x128xf32>
    %cst_131 = arith.constant dense<0.000000e+00> : vector<16xf32>
    %293 = vector.multi_reduction <add>, %288, %cst_131 [1] : vector<16x128xf32> to vector<16xf32>
    %294 = vector.shape_cast %293 : vector<16xf32> to vector<16x1xf32>
    %cst_132 = arith.constant 3.125000e-02 : f32
    %295 = vector.broadcast %cst_132 : f32 to vector<16x1xf32>
    %296 = arith.mulf %294, %295 : vector<16x1xf32>
    %297 = arith.mulf %288, %288 : vector<16x128xf32>
    %cst_133 = arith.constant dense<0.000000e+00> : vector<16xf32>
    %298 = vector.multi_reduction <add>, %297, %cst_133 [1] : vector<16x128xf32> to vector<16xf32>
    %299 = vector.shape_cast %298 : vector<16xf32> to vector<16x1xf32>
    %cst_134 = arith.constant 3.125000e-02 : f32
    %300 = vector.broadcast %cst_134 : f32 to vector<16x1xf32>
    %301 = arith.mulf %299, %300 : vector<16x1xf32>
    %302 = arith.mulf %296, %296 : vector<16x1xf32>
    %303 = arith.subf %301, %302 : vector<16x1xf32>
    %304 = vector.broadcast %296 : vector<16x1xf32> to vector<16x128xf32>
    %305 = arith.subf %288, %304 : vector<16x128xf32>
    %cst_135 = arith.constant 9.99999996E-13 : f32
    %306 = vector.broadcast %cst_135 : f32 to vector<16x1xf32>
    %307 = arith.addf %303, %306 : vector<16x1xf32>
    %308 = math.rsqrt %307 : vector<16x1xf32>
    %309 = vector.broadcast %308 : vector<16x1xf32> to vector<16x128xf32>
    %310 = arith.mulf %305, %309 : vector<16x128xf32>
    %311 = vector.broadcast %291 : vector<1x128xf32> to vector<16x128xf32>
    %312 = arith.mulf %310, %311 : vector<16x128xf32>
    %313 = vector.broadcast %292 : vector<1x128xf32> to vector<16x128xf32>
    %314 = arith.addf %312, %313 : vector<16x128xf32>
    %315 = vector.extract_strided_slice %314 {offsets = [0, 0], sizes = [1, 128], strides = [1, 1]} : vector<16x128xf32> to vector<1x128xf32>
    %c0_136 = arith.constant 0 : index
    %c0_137 = arith.constant 0 : index
    %316 = vector.load %arg13[%c0_136, %c0_137] : memref<2x128xf32, #tpu.memory_space<vmem>>, vector<1x128xf32>
    tpu.vector_store %arg13[%c0_136, %c0_137], %315 {strides = array<i32>} : memref<2x128xf32, #tpu.memory_space<vmem>>, vector<1x128xf32>,
    %317 = vector.extract_strided_slice %314 {offsets = [8, 0], sizes = [1, 128], strides = [1, 1]} : vector<16x128xf32> to vector<1x128xf32>
    %c1_138 = arith.constant 1 : index
    %c0_139 = arith.constant 0 : index
    %318 = vector.load %arg13[%c1_138, %c0_139] : memref<2x128xf32, #tpu.memory_space<vmem>>, vector<1x128xf32>
    tpu.vector_store %arg13[%c1_138, %c0_139], %317 {strides = array<i32>} : memref<2x128xf32, #tpu.memory_space<vmem>>, vector<1x128xf32>,
    return
  }
}

</mosaic_0001>

<bundles_post_ra>
// kernel: tpu_custom_call.1
= control target key start
LH: loop header
LB: loop body
LE: loop exit
PB: predicated region body
PF: predicated region fallthrough
CT: control target
= control target key end

     0   :  { %18 = vsyncpa [#allocation3], 0  ;;  %s4203_s0 = inlined_call_operand.hbm [shape: f32[16,128], index: 0, kind: input, shape index: {}]   ;;  %s4204_s1 = inlined_call_operand.hbm [shape: f32[16,16], index: 1, kind: input, shape index: {}]   ;;  %s4205_s2 = inlined_call_operand.hbm [shape: f32[2,128], index: 2, kind: input, shape index: {}]   ;;  %s4206_s3 = inlined_call_operand.hbm [shape: bf16[2,128,768], index: 3, kind: input, shape index: {}]   ;;  %s4207_s4 = inlined_call_operand.hbm [shape: f32[2,1,768], index: 4, kind: input, shape index: {}]   ;;  %s4208_s5 = inlined_call_operand.hbm [shape: bf16[2,2,128,128], index: 5, kind: input, shape index: {}]   ;;  %s4209_s6 = inlined_call_operand.vmem [shape: f32[2,1,128], index: 6, kind: input, shape index: {}]   ;;  %s4210_s7 = inlined_call_operand.vmem [shape: f32[2,2,128], index: 7, kind: input, shape index: {}]   ;;  %s4211_s8 = inlined_call_operand.hbm [shape: bf16[2,128,128], index: 8, kind: input, shape index: {}]   ;;  %s4212_s9 = inlined_call_operand.vmem [shape: f32[2,1,128], index: 9, kind: input, shape index: {}]   ;;  %s4213_s10 = inlined_call_operand.hbm [shape: bf16[2,128,128], index: 10, kind: input, shape index: {}]   ;;  %s4214_s11 = inlined_call_operand.vmem [shape: f32[2,1,128], index: 11, kind: input, shape index: {}]   ;;  %s4215_s12 = inlined_call_operand.vmem [shape: f32[2,2,128], index: 12, kind: input, shape index: {}]   ;;  %s4216_s13 = inlined_call_operand.hbm [shape: f32[2,128], index: 13, kind: output, shape index: {}]  }
   0x1   :  { %19 = vsyncpa [#allocation6], 0 }
   0x2   :  { %20 = vsyncpa [#allocation9], 0 }
   0x3   :  { %21 = vsyncpa [#allocation12], 0 }
   0x4   :  { %22 = vsyncpa [#allocation15], 0 }
   0x5   :  { %23 = vsyncpa [#allocation4], 0  ;;  %s3777_s25 = smov [#allocation5]   ;;  %s3778_s27 = smov [#allocation8]  }
   0x6   :  { %s41_s26 = sshll.u32 %s3777_s25, 4  ;;  %s63_s28 = sshll.u32 %s3778_s27, 4  ;;  %s42_s26 = int_to_ptr.vmem [resolvable:$true] %s41_s26  ;;  %s64_s28 = int_to_ptr.vmem [resolvable:$true] %s63_s28 }
   0x7   :  { %s3593_s29 = scalar_lea.vmem %s42_s26, 256  ;;  %p3598_p1 = scmp.lt.s32.totalorder %s42_s26, %s42_s26 }
   0x8   :  { %p3594_p0 = scmp.ne.s32.totalorder %s42_s26, %s3593_s29  ;;  %p3599_p2 = scmp.lt.s32.totalorder %s3593_s29, %s3593_s29 }
   0xa   :  { %p3600_p3 = por %p3599_p2, %p3598_p1 }
   0xc   :  { %p3601_p4 = pnand %p3600_p3, %p3594_p0 }
   0xe   :  { %3604 = shalt.err (!%p3601_p4)
}
   0xf   :  { %s3779_s30 = smov 128   ;;  %s3780_s14 = smov 8  }
  0x10   :  { %47 = dma.hbm_to_vmem [thread:$0]  %s4204_s1, 256, %s42_s26, [#allocation6], %s3779_s30, %s3779_s30, %s3780_s14  }
  0x11   :  { %s3613_s17 = scalar_lea.vmem %s64_s28, 12288  ;;  %p3618_p6 = scmp.lt.s32.totalorder %s64_s28, %s64_s28 }
  0x12   :  { %p3614_p5 = scmp.ne.s32.totalorder %s64_s28, %s3613_s17  ;;  %p3619_p7 = scmp.lt.s32.totalorder %s3613_s17, %s3613_s17 }
  0x14   :  { %p3620_p8 = por %p3619_p7, %p3618_p6 }
  0x16   :  { %p3621_p9 = pnand %p3620_p8, %p3614_p5 }
  0x18   :  { %3624 = shalt.err (!%p3621_p9)
}
  0x19   :  { %s3781_s18 = smov 384   ;;  %s3782_s19 = smov 24  }
  0x1a   :  { %69 = dma.hbm_to_vmem [thread:$0]  %s4206_s3, 12288, %s64_s28, [#allocation9], %s3781_s18, %s3781_s18, %s3782_s19  }
  0x1b   :  { %s3783_s22 = smov [#allocation11]  }
  0x1c   :  { %s87_s23 = sshll.u32 %s3783_s22, 4  ;;  %s88_s23 = int_to_ptr.vmem [resolvable:$true] %s87_s23 }
  0x1d   :  { %s3633_s24 = scalar_lea.vmem %s88_s23, 4096  ;;  %p3638_p11 = scmp.lt.s32.totalorder %s88_s23, %s88_s23 }
  0x1e   :  { %p3634_p10 = scmp.ne.s32.totalorder %s88_s23, %s3633_s24  ;;  %p3639_p12 = scmp.lt.s32.totalorder %s3633_s24, %s3633_s24 }
  0x20   :  { %p3640_p13 = por %p3639_p12, %p3638_p11 }
  0x22   :  { %p3641_p0 = pnand %p3640_p13, %p3634_p10 }
  0x24   :  { %3644 = shalt.err (!%p3641_p0)
}
  0x25   :  { %s3784_s1 = smov 64   ;;  %s3785_s25 = smov 4  }
  0x26   :  { %93 = dma.hbm_to_vmem [thread:$0]  %s4208_s5, 4096, %s88_s23, [#allocation12], %s3784_s1, %s3784_s1, %s3785_s25  }
  0x27   :  { %s3786_s3 = smov [#allocation2]   ;;  %s3787_s29 = smov [#allocation7]  }
  0x28   :  { %s29_s28 = sshll.u32 %s3786_s3, 4  ;;  %s54_s15 = sshll.u32 %s3787_s29, 4  ;;  %s30_s28 = int_to_ptr.vmem [resolvable:$true] %s29_s28  ;;  %s55_s15 = int_to_ptr.vmem [resolvable:$true] %s54_s15 }
  0x29   :  { %s3653_s16 = scalar_lea.vmem %s30_s28, 256  ;;  %p3658_p2 = scmp.lt.s32.totalorder %s30_s28, %s30_s28 }
  0x2a   :  { %p3654_p1 = scmp.ne.s32.totalorder %s30_s28, %s3653_s16  ;;  %p3659_p3 = scmp.lt.s32.totalorder %s3653_s16, %s3653_s16 }
  0x2c   :  { %p3660_p4 = por %p3659_p3, %p3658_p2 }
  0x2e   :  { %p3661_p5 = pnand %p3660_p4, %p3654_p1 }
  0x30   :  { %3664 = shalt.err (!%p3661_p5)
}
  0x31   :  { %35 = dma.hbm_to_vmem [thread:$0]  %s4203_s0, 256, %s30_s28, [#allocation3], %s3779_s30, %s3779_s30, %s3780_s14  }
  0x32   :  { %s3673_s5 = scalar_lea.vmem %s55_s15, 32  ;;  %p3678_p7 = scmp.lt.s32.totalorder %s55_s15, %s55_s15 }
  0x33   :  { %p3674_p6 = scmp.ne.s32.totalorder %s55_s15, %s3673_s5  ;;  %p3679_p8 = scmp.lt.s32.totalorder %s3673_s5, %s3673_s5 }
  0x35   :  { %p3680_p9 = por %p3679_p8, %p3678_p7 }
  0x37   :  { %p3681_p10 = pnand %p3680_p9, %p3674_p6 }
  0x39   :  { %3684 = shalt.err (!%p3681_p10)
}
  0x3a   :  { %57 = dma.hbm_to_vmem [thread:$0]  %s4205_s2, 32, %s55_s15, [#allocation6]  }
  0x3b   :  { %s3788_s21 = smov [#allocation10]  }
  0x3c   :  { %s75_s22 = sshll.u32 %s3788_s21, 4  ;;  %s76_s22 = int_to_ptr.vmem [resolvable:$true] %s75_s22 }
  0x3d   :  { %s3693_s23 = scalar_lea.vmem %s76_s22, 192  ;;  %p3698_p12 = scmp.lt.s32.totalorder %s76_s22, %s76_s22 }
  0x3e   :  { %p3694_p11 = scmp.ne.s32.totalorder %s76_s22, %s3693_s23  ;;  %p3699_p13 = scmp.lt.s32.totalorder %s3693_s23, %s3693_s23 }
  0x40   :  { %p3700_p0 = por %p3699_p13, %p3698_p12 }
  0x42   :  { %p3701_p1 = pnand %p3700_p0, %p3694_p11 }
  0x44   :  { %3704 = shalt.err (!%p3701_p1)
}
  0x45   :  { %s3789_s0 = smov 96   ;;  %s3790_s30 = smov 6  }
  0x46   :  { %81 = dma.hbm_to_vmem [thread:$0]  %s4207_s4, 192, %s76_s22, [#allocation9], %s3789_s0, %s3789_s0, %s3790_s30  }
  0x47   :  { %s3791_s26 = smov [#allocation13]   ;;  %s3792_s3 = smov [#allocation14]  }
  0x48   :  { %s103_s27 = sshll.u32 %s3791_s26, 4  ;;  %s117_s2 = sshll.u32 %s3792_s3, 4  ;;  %s104_s27 = int_to_ptr.vmem [resolvable:$true] %s103_s27  ;;  %s118_s2 = int_to_ptr.vmem [resolvable:$true] %s117_s2 }
  0x49   :  { %s3713_s28 = scalar_lea.vmem %s104_s27, 2048  ;;  %p3718_p3 = scmp.lt.s32.totalorder %s104_s27, %s104_s27 }
  0x4a   :  { %p3714_p2 = scmp.ne.s32.totalorder %s104_s27, %s3713_s28  ;;  %p3719_p4 = scmp.lt.s32.totalorder %s3713_s28, %s3713_s28 }
  0x4c   :  { %p3720_p5 = por %p3719_p4, %p3718_p3 }
  0x4e   :  { %p3721_p6 = pnand %p3720_p5, %p3714_p2 }
  0x50   :  { %3724 = shalt.err (!%p3721_p6)
}
  0x51   :  { %109 = dma.hbm_to_vmem [thread:$0]  %s4211_s8, 2048, %s104_s27, [#allocation12], %s3784_s1, %s3784_s1, %s3785_s25  }
  0x52   :  { %s3733_s4 = scalar_lea.vmem %s118_s2, 2048  ;;  %p3738_p8 = scmp.lt.s32.totalorder %s118_s2, %s118_s2 }
  0x53   :  { %p3734_p7 = scmp.ne.s32.totalorder %s118_s2, %s3733_s4  ;;  %p3739_p9 = scmp.lt.s32.totalorder %s3733_s4, %s3733_s4 }
  0x55   :  { %p3740_p10 = por %p3739_p9, %p3738_p8 }
  0x57   :  { %p3741_p11 = pnand %p3740_p10, %p3734_p7 }
  0x59   :  { %3744 = shalt.err (!%p3741_p11)
}
  0x5a   :  { %123 = dma.hbm_to_vmem [thread:$0]  %s4213_s10, 2048, %s118_s2, [#allocation15], %s3784_s1, %s3784_s1, %s3785_s25  }
  0x5b   :  { %3765 = dma.done.wait [#allocation3], 256  }
  0x5c   :  { %3766 = vsyncadd [#allocation3], 4294967040 }
  0x5d   :  { %3767 = dma.done.wait [#allocation6], 288  }
  0x5e   :  { %3768 = vsyncadd [#allocation6], 4294967008 }
  0x5f   :  { %3769 = dma.done.wait [#allocation9], 12480  }
  0x60   :  { %3770 = vsyncadd [#allocation9], 4294954816 }
  0x61   :  { %3771 = dma.done.wait [#allocation12], 6144  }
  0x62   :  { %3772 = vsyncadd [#allocation12], 4294961152 }
  0x63   :  { %3773 = dma.done.wait [#allocation15], 2048  }
  0x64   :  { %3774 = vsyncadd [#allocation15], 4294965248  ;;  %v3906_v0 = vld [vmem:[#allocation2] sm:$0xff]  ;;  %v3908_v1 = vld [vmem:[#allocation2 + $0x8] sm:$0xff]  ;;  %v3793_v31 = vmov 0   ;;  %v184_v52 = vlaneseq  ;;  %vm725_vm0 = vcmask 130048  }
  0x65   :  { %158 = vadd.xlane.f32.xlu0 %v3906_v0  ;;  %v164_v2 = vmul.f32 %v3906_v0, %v3906_v0  ;;  %v165_v3 = vmul.f32 %v3908_v1, %v3908_v1  ;;  %v3315_v4 = vld [vmem:[#allocation8 + $0x154] ss:$24 sps:$4 sm:$0xff]   ;;  %v3317_v5 = vld [vmem:[#allocation8 + $0x150] ss:$24 sps:$4 sm:$0xff]   ;;  %v3321_v8 = vld [vmem:[#allocation8 + $0x124] ss:$24 sps:$4 sm:$0xff]   ;;  %549 = vmatprep.mubr.bf16.mxu0 %v3793_v31 }
  0x66   :  { %v3318_v6 = vld [vmem:[#allocation8 + $0x15c] ss:$24 sps:$4 sm:$0xff]   ;;  %517 = vmatprep.subr.bf16.mxu0 %v3315_v4  ;;  %v3320_v7 = vld [vmem:[#allocation8 + $0x158] ss:$24 sps:$4 sm:$0xff]   ;;  %v3324_v10 = vld [vmem:[#allocation8 + $0x12c] ss:$24 sps:$4 sm:$0xff]   ;;  %592 = vmatprep.mubr.bf16.mxu1 %v3793_v31 }
  0x67   :  { %166 = vadd.xlane.f32.xlu1 %v164_v2  ;;  %518 = vmatpush1.bf16.msra.mxu0 %v3317_v5  ;;  %v3323_v9 = vld [vmem:[#allocation8 + $0x120] ss:$24 sps:$4 sm:$0xff]   ;;  %v3327_v12 = vld [vmem:[#allocation8 + $0xf4] ss:$24 sps:$4 sm:$0xff]   ;;  %v3329_v13 = vld [vmem:[#allocation8 + $0xf0] ss:$24 sps:$4 sm:$0xff]  }
  0x68   :  { %560 = vmatprep.subr.bf16.mxu1 %v3318_v6  ;;  %519 = vmatprep.subr.bf16.mxu0 %v3321_v8  ;;  %v3326_v11 = vld [vmem:[#allocation8 + $0x128] ss:$24 sps:$4 sm:$0xff]   ;;  %v3330_v14 = vld [vmem:[#allocation8 + $0xfc] ss:$24 sps:$4 sm:$0xff]   ;;  %v3332_v15 = vld [vmem:[#allocation8 + $0xf8] ss:$24 sps:$4 sm:$0xff]  }
  0x69   :  { %160 = vadd.xlane.f32.xlu0 %v3908_v1  ;;  %561 = vmatpush1.bf16.msra.mxu1 %v3320_v7  ;;  %v3333_v16 = vld [vmem:[#allocation8 + $0xc4] ss:$24 sps:$4 sm:$0xff]   ;;  %v3335_v17 = vld [vmem:[#allocation8 + $0xc0] ss:$24 sps:$4 sm:$0xff]   ;;  %v3339_v20 = vld [vmem:[#allocation8 + $0x94] ss:$24 sps:$4 sm:$0xff]  }
  0x6a   :  { %562 = vmatprep.subr.bf16.mxu1 %v3324_v10  ;;  %v3336_v18 = vld [vmem:[#allocation8 + $0xcc] ss:$24 sps:$4 sm:$0xff]   ;;  %v3338_v19 = vld [vmem:[#allocation8 + $0xc8] ss:$24 sps:$4 sm:$0xff]   ;;  %v3342_v21 = vld [vmem:[#allocation8 + $0x9c] ss:$24 sps:$4 sm:$0xff]  }
  0x6b   :  { %168 = vadd.xlane.f32.xlu1 %v165_v3  ;;  %520 = vmatpush1.bf16.msra.mxu0 %v3323_v9  ;;  %v3341_v22 = vld [vmem:[#allocation8 + $0x90] ss:$24 sps:$4 sm:$0xff]   ;;  %v3345_v24 = vld [vmem:[#allocation8 + $0x64] ss:$24 sps:$4 sm:$0xff]   ;;  %v3347_v26 = vld [vmem:[#allocation8 + $0x60] ss:$24 sps:$4 sm:$0xff]  }
  0x6c   :  { %521 = vmatprep.subr.bf16.mxu0 %v3327_v12  ;;  %v3344_v23 = vld [vmem:[#allocation8 + $0x98] ss:$24 sps:$4 sm:$0xff]   ;;  %v3348_v25 = vld [vmem:[#allocation8 + $0x6c] ss:$24 sps:$4 sm:$0xff]   ;;  %v3350_v27 = vld [vmem:[#allocation8 + $0x68] ss:$24 sps:$4 sm:$0xff]  }
  0x6d   :  { %563 = vmatpush1.bf16.msra.mxu1 %v3326_v11  ;;  %v3351_v28 = vld [vmem:[#allocation8 + $0x34] ss:$24 sps:$4 sm:$0xff]   ;;  %v3353_v30 = vld [vmem:[#allocation8 + $0x30] ss:$24 sps:$4 sm:$0xff]   ;;  %v3357_v33 = vld [vmem:[#allocation8 + $0x4] ss:$24 sps:$4 sm:$0xff]  }
  0x6e   :  { %564 = vmatprep.subr.bf16.mxu1 %v3330_v14  ;;  %v3354_v29 = vld [vmem:[#allocation8 + $0x3c] ss:$24 sps:$4 sm:$0xff]   ;;  %v3356_v32 = vld [vmem:[#allocation8 + $0x38] ss:$24 sps:$4 sm:$0xff]   ;;  %v3360_v34 = vld [vmem:[#allocation8 + $0xc] ss:$24 sps:$4 sm:$0xff]  }
  0x6f   :  { %522 = vmatpush1.bf16.msra.mxu0 %v3329_v13  ;;  %v3359_v35 = vld [vmem:[#allocation8] ss:$24 sps:$4 sm:$0xff]   ;;  %v3365_v37 = vld [vmem:[#allocation8 + $0x164] ss:$24 sps:$4 sm:$0xff]   ;;  %v3918_v53 = vshrl.u32 %v184_v52, 7  ;;  %vm3795_vm1 = vmmov 0  }
  0x70   :  { %523 = vmatprep.subr.bf16.mxu0 %v3333_v16  ;;  %v3362_v36 = vld [vmem:[#allocation8 + $0x8] ss:$24 sps:$4 sm:$0xff]   ;;  %v157_v55 = vld [vmem:[#allocation7] sm:$0x3]  ;;  %v3368_v8 = vld [vmem:[#allocation8 + $0x134] ss:$24 sps:$4 sm:$0xff]  }
  0x71   :  { %565 = vmatpush1.bf16.msra.mxu1 %v3332_v15  ;;  %v3921_v54 = vsub.s32 0, %v3918_v53  ;;  %v3926_v60 = vsub.s32 1, %v3918_v53  ;;  %v3366_v9 = vld [vmem:[#allocation8 + $0x130] ss:$24 sps:$4 sm:$0xff]   ;;  %v3369_v10 = vld [vmem:[#allocation8 + $0x100] ss:$24 sps:$4 sm:$0xff]  }
  0x72   :  { %566 = vmatprep.subr.bf16.mxu1 %v3336_v18  ;;  %v3374_v11 = vld [vmem:[#allocation8 + $0xd4] ss:$24 sps:$4 sm:$0xff]   ;;  %v3372_v12 = vld [vmem:[#allocation8 + $0xd0] ss:$24 sps:$4 sm:$0xff]   ;;  %v3377_v13 = vld [vmem:[#allocation8 + $0xa4] ss:$24 sps:$4 sm:$0xff]  }
  0x73   :  { %524 = vmatpush1.bf16.msra.mxu0 %v3335_v17  ;;  %v187_v59 = vrot.slane %v157_v55, %v3921_v54  ;;  %v193_v3 = vrot.slane %v157_v55, %v3926_v60  ;;  %v3375_v14 = vld [vmem:[#allocation8 + $0xa0] ss:$24 sps:$4 sm:$0xff]   ;;  %v3380_v15 = vld [vmem:[#allocation8 + $0x74] ss:$24 sps:$4 sm:$0xff]   ;;  %v3378_v16 = vld [vmem:[#allocation8 + $0x70] ss:$24 sps:$4 sm:$0xff]  }
  0x74   :  { %525 = vmatprep.subr.bf16.mxu0 %v3339_v20  ;;  %v3383_v17 = vld [vmem:[#allocation8 + $0x44] ss:$24 sps:$4 sm:$0xff]   ;;  %v3381_v18 = vld [vmem:[#allocation8 + $0x40] ss:$24 sps:$4 sm:$0xff]   ;;  %v3384_v20 = vld [vmem:[#allocation8 + $0x10] ss:$24 sps:$4 sm:$0xff]  }
  0x75   :  { %567 = vmatpush1.bf16.msra.mxu1 %v3338_v19  ;;  %v3386_v19 = vld [vmem:[#allocation8 + $0x14] ss:$24 sps:$4 sm:$0xff]   ;;  %s3796_s27 = smov [#allocation16]  }
  0x76   :  { %568 = vmatprep.subr.bf16.mxu1 %v3342_v21  ;;  %v3794_v21 = vmov 0.0   ;;  %v3966_v52 = vld [vmem:[#allocation5 + $0x8] sm:$0xff]  ;;  %s2799_s3 = sshll.u32 %s3796_s27, 4  ;;  %s2800_s3 = int_to_ptr.vmem [resolvable:$true] %s2799_s3 }
  0x77   :  { %526 = vmatpush1.bf16.msra.mxu0 %v3341_v22  ;;  %v3938_v22 = vld [vmem:[#allocation10] sm:$0x3f]  ;;  %p3750_p13 = scmp.lt.s32.totalorder %s2800_s3, %s2800_s3 }
  0x78   :  { %527 = vmatprep.subr.bf16.mxu0 %v3345_v24  ;;  %v250_v24 = vrot.slane %v3938_v22, %v3921_v54 }
  0x79   :  { %569 = vmatpush1.bf16.msra.mxu1 %v3344_v23  ;;  %v261_v23 = vsub.s32 3, %v3918_v53 }
  0x7a   :  { %570 = vmatprep.subr.bf16.mxu1 %v3348_v25  ;;  %v257_v25 = vsub.s32 2, %v3918_v53 }
  0x7b   :  { %528 = vmatpush1.bf16.msra.mxu0 %v3347_v26  ;;  %v262_v26 = vrot.slane %v3938_v22, %v261_v23 }
  0x7c   :  { %529 = vmatprep.subr.bf16.mxu0 %v3351_v28 }
  0x7d   :  { %571 = vmatpush1.bf16.msra.mxu1 %v3350_v27 }
  0x7e   :  { %572 = vmatprep.subr.bf16.mxu1 %v3354_v29 }
  0x7f   :  { %530 = vmatpush1.bf16.msra.mxu0 %v3353_v30 }
  0x80   :  { %531 = vmatprep.subr.bf16.mxu0 %v3357_v33 }
  0x81   :  { %573 = vmatpush1.bf16.msra.mxu1 %v3356_v32  ;;  %v258_v32 = vrot.slane %v3938_v22, %v257_v25 }
  0x82   :  { %574 = vmatprep.subr.bf16.mxu1 %v3360_v34 }
  0x83   :  { %532 = vmatpush1.bf16.msra.mxu0 %v3359_v35 }
  0x84   :  { %603 = vmatprep.subr.bf16.mxu0 %v3365_v37 }
  0x85   :  { %575 = vmatpush1.bf16.msra.mxu1 %v3362_v36 }
  0xee   :  { %v159_v38 = vpop.xlane.xlu0 %158 }
  0xef   :  { %v162_v39 = vmul.f32 0.03125, %v159_v38 }
  0xf0   :  { %v167_v40 = vpop.xlane.xlu1 %166 }
  0xf1   :  { %v172_v41 = vmul.f32 %v162_v39, %v162_v39  ;;  %v170_v42 = vmul.f32 0.03125, %v167_v40  ;;  %v176_v56 = vsub.f32 %v3906_v0, %v162_v39  ;;  %v3363_v0 = vld [vmem:[#allocation8 + $0x160] ss:$24 sps:$4 sm:$0xff]   ;;  %v265_v40 = vsub.s32 4, %v3918_v53 }
  0xf2   :  { %v161_v43 = vpop.xlane.xlu0 %160 }
  0xf3   :  { %v174_v44 = vsub.f32 %v170_v42, %v172_v41  ;;  %v163_v45 = vmul.f32 0.03125, %v161_v43  ;;  %v266_v43 = vrot.slane %v3938_v22, %v265_v40 }
  0xf4   :  { %v169_v46 = vpop.xlane.xlu1 %168 }
  0xf5   :  { %v178_v47 = vadd.f32 1e-12, %v174_v44  ;;  %v173_v48 = vmul.f32 %v163_v45, %v163_v45  ;;  %v171_v49 = vmul.f32 0.03125, %v169_v46  ;;  %v177_v61 = vsub.f32 %v3908_v1, %v163_v45  ;;  %v3371_v1 = vld [vmem:[#allocation8 + $0x104] ss:$24 sps:$4 sm:$0xff]  }
  0xf7   :  { %3523 = vrsqrt.f32 %v178_v47  ;;  %v175_v50 = vsub.f32 %v171_v49, %v173_v48 }
  0xf9   :  { %v179_v51 = vadd.f32 1e-12, %v175_v50 }
  0xfb   :  { %3525 = vrsqrt.f32 %v179_v51 }
 0x104   :  { %v3524_v57 = vpop.eup %3523 }
 0x105   :  { %v182_v58 = vmul.f32 %v3524_v57, %v176_v56  ;;  %v3968_v57 = vld [vmem:[#allocation5] sm:$0xff] }
 0x107   :  { %v188_v2 = vmul.f32 %v187_v59, %v182_v58 }
 0x108   :  { %v3526_v62 = vpop.eup %3525 }
 0x109   :  { %v183_v63 = vmul.f32 %v3526_v62, %v177_v61  ;;  %v3930_v5 = vadd.f32 %v193_v3, %v188_v2 }
 0x10b   :  { %v189_v4 = vmul.f32 %v187_v59, %v183_v63 }
 0x10d   :  { %v3932_v6 = vadd.f32 %v193_v3, %v189_v4 }
 0x10f   :  { %v196_v7 = vpack.c.bf16 %v3932_v6, %v3930_v5 }
 0x111   :  { %550 = vmatmul.mubr.bf16.vlgmr.msra.gmra.mxu0 %v196_v7  ;;  %593 = vmatmul.mubr.bf16.vlgmr.msra.gmra.mxu1 %v196_v7 }
 0x112   :  { %604 = vmatpush1.bf16.msra.mxu0 %v3363_v0  ;;  %635 = vmatprep.mubr.bf16.mxu0 %v3793_v31 }
 0x113   :  { %605 = vmatprep.subr.bf16.mxu0 %v3368_v8 }
 0x116   :  { %606 = vmatpush1.bf16.msra.mxu0 %v3366_v9 }
 0x117   :  { %607 = vmatprep.subr.bf16.mxu0 %v3371_v1 }
 0x11a   :  { %608 = vmatpush1.bf16.msra.mxu0 %v3369_v10 }
 0x11b   :  { %609 = vmatprep.subr.bf16.mxu0 %v3374_v11 }
 0x11e   :  { %610 = vmatpush1.bf16.msra.mxu0 %v3372_v12  ;;  %v3387_v12 = vld [vmem:[#allocation11 + $0x38] sm:$0xff]  }
 0x11f   :  { %611 = vmatprep.subr.bf16.mxu0 %v3377_v13  ;;  %v3388_v13 = vld [vmem:[#allocation11 + $0x30] sm:$0xff]  }
 0x122   :  { %612 = vmatpush1.bf16.msra.mxu0 %v3375_v14  ;;  %v3389_v14 = vld [vmem:[#allocation11 + $0x28] sm:$0xff]  }
 0x123   :  { %613 = vmatprep.subr.bf16.mxu0 %v3380_v15  ;;  %v3390_v15 = vld [vmem:[#allocation11 + $0x20] sm:$0xff]  }
 0x126   :  { %614 = vmatpush1.bf16.msra.mxu0 %v3378_v16  ;;  %v3391_v16 = vld [vmem:[#allocation11 + $0x18] sm:$0xff]  }
 0x127   :  { %615 = vmatprep.subr.bf16.mxu0 %v3383_v17  ;;  %v3392_v17 = vld [vmem:[#allocation11 + $0x10] sm:$0xff]  }
 0x12a   :  { %616 = vmatpush1.bf16.msra.mxu0 %v3381_v18 }
 0x12b   :  { %617 = vmatprep.subr.bf16.mxu0 %v3386_v19 }
 0x12e   :  { %618 = vmatpush1.bf16.msra.mxu0 %v3384_v20 }
 0x12f   :  { %3129 = vmatprep.subr.bf16.mxu0 %v3794_v21 }
 0x131   :  { %636 = vmatmul.mubr.bf16.vlgmr.msra.gmra.mxu0 %v196_v7 }
 0x132   :  { %3145 = vmatprep.mubr.msk.bf16.mxu0 %vm3795_vm1, %v3794_v21  ;;  %3130 = vmatpush3.bf16.msra.mxu0 %v3387_v12 }
 0x133   :  { %3131 = vmatprep.subr.bf16.mxu0 %v3794_v21 }
 0x136   :  { %3132 = vmatpush3.bf16.msra.mxu0 %v3388_v13 }
 0x137   :  { %3133 = vmatprep.subr.bf16.mxu0 %v3794_v21 }
 0x13a   :  { %3134 = vmatpush3.bf16.msra.mxu0 %v3389_v14 }
 0x13b   :  { %3135 = vmatprep.subr.bf16.mxu0 %v3794_v21 }
 0x13e   :  { %3136 = vmatpush3.bf16.msra.mxu0 %v3390_v15 }
 0x13f   :  { %3137 = vmatprep.subr.bf16.mxu0 %v3794_v21 }
 0x142   :  { %3138 = vmatpush3.bf16.msra.mxu0 %v3391_v16 }
 0x143   :  { %3139 = vmatprep.subr.bf16.mxu0 %v3794_v21 }
 0x146   :  { %3140 = vmatpush3.bf16.msra.mxu0 %v3392_v17  ;;  %v3395_v17 = vld [vmem:[#allocation11 + $0x78] sm:$0xff]  }
 0x147   :  { %3141 = vmatprep.subr.bf16.mxu0 %v3794_v21 }
 0x1d1   :  { %v551_v27 = vpop.f32.mrf.mxu0  ;;  %v594_v28 = vpop.f32.mrf.mxu1 }
 0x1d2   :  { %v552_v29 = vadd.f32 %v551_v27, %v250_v24  ;;  %v595_v37 = vadd.f32 %v594_v28, %v258_v32 }
 0x1d3   :  { %v596_v30 = vpop.f32.mrf.mxu1  ;;  %v3952_v36 = vpop.f32.mrf.mxu0 }
 0x1d4   :  { %v3950_v33 = vadd.f32 %v596_v30, %v262_v26  ;;  %3087 = vmatprep.mubr.f32.mxu1 %v552_v29  ;;  %v269_v29 = vsub.s32 5, %v3918_v53  ;;  %v3497_v53 = vld [vmem:[#allocation11 + $0x88] sm:$0xff]  }
 0x1d5   :  { %v598_v34 = vpop.f32.mrf.mxu1  ;;  %v555_v38 = vpop.f32.mrf.mxu0 }
 0x1d6   :  { %v599_v35 = vadd.f32 %v598_v34, %v258_v32  ;;  %v556_v39 = vadd.f32 %v555_v38, %v250_v24 }
 0x1d7   :  { %v3956_v41 = vpop.f32.mrf.mxu0  ;;  %v600_v46 = vpop.f32.mrf.mxu1 }
 0x1d8   :  { %3083 = vmatprep.subr.mxu1 %v599_v35  ;;  %v3963_v50 = vadd.f32 %v600_v46, %v262_v26  ;;  %v254_v26 = vrot.slane %v3938_v22, %v3926_v60 }
 0x1d9   :  { %3084 = vmatpush3.xpose.msra.mxu1 %v599_v35  ;;  %v270_v35 = vrot.slane %v3938_v22, %v269_v29  ;;  %v3393_v22 = vld [vmem:[#allocation11 + $0x8] sm:$0xff]  }
 0x1da   :  { %3085 = vmatprep.subr.mxu1 %v595_v37  ;;  %v554_v32 = vadd.f32 %v3952_v36, %v254_v26  ;;  %3142 = vmatpush3.bf16.msra.mxu0 %v3393_v22 }
 0x1db   :  { %3143 = vmatprep.subr.bf16.mxu0 %v3794_v21 }
 0x1dd   :  { %3086 = vmatpush3.xpose.msra.mxu1 %v595_v37 }
 0x1de   :  { %3090 = vmatprep.subr.bf16.mxu1 %v3794_v21 }
 0x1e0   :  { %3088 = vmatmul.mubr.f32.vlgmr.msra.gmra.mxu1 %v556_v39  ;;  %v558_v39 = vadd.f32 %v3956_v41, %v254_v26  ;;  %v3399_v26 = vld [vmem:[#allocation11 + $0x58] sm:$0xff]  }
 0x1e1   :  { %3092 = vmatprep.mubr.msk.bf16.mxu1 %vm3795_vm1, %v3794_v21 }
 0x1f1   :  { %v637_v42 = vpop.f32.mrf.mxu0 }
 0x1f2   :  { %v638_v47 = vadd.f32 %v637_v42, %v266_v43  ;;  %v3394_v42 = vld [vmem:[#allocation11] sm:$0xff]  }
 0x1f3   :  { %v3961_v44 = vpop.f32.mrf.mxu0  ;;  %3144 = vmatpush3.bf16.msra.mxu0 %v3394_v42 }
 0x1f4   :  { %v640_v38 = vadd.f32 %v3961_v44, %v270_v35  ;;  %3169 = vmatprep.subr.bf16.mxu0 %v3794_v21 }
 0x1f5   :  { %v641_v45 = vpop.f32.mrf.mxu0 }
 0x1f6   :  { %v642_v48 = vadd.f32 %v641_v45, %v266_v43 }
 0x1f7   :  { %v643_v34 = vpop.f32.mrf.mxu0 }
 0x1f8   :  { %v749_v49 = vpack.c.bf16 %v642_v48, %v638_v47  ;;  %v644_v37 = vadd.f32 %v643_v34, %v270_v35 }
 0x1fa   :  { %3091 = vmatpush3.bf16.msra.mxu1 %v749_v49  ;;  %v913_v36 = vpack.c.bf16 %v644_v37, %v640_v38 }
 0x1fb   :  { %3096 = vmatprep.subr.mxu1 %v3963_v50 }
 0x2a0   :  { %v3089_v51 = vpop.f32.mrf.mxu1 }
 0x2a1   :  { %v722_v55 = vmul.f32 0.25, %v3089_v51 }
 0x2a2   :  { %v712_v56 = vpop.f32.mrf.mxu1 }
 0x2a3   :  { %v721_v58 = vmul.f32 0.25, %v712_v56  ;;  %v724_v59 = vadd.f32 %v722_v55, %v3966_v52 }
 0x2a5   :  { %v729_v61 = vsel %vm725_vm0, %v724_v59, -inf  ;;  %v723_v62 = vadd.f32 %v721_v58, %v3968_v57 }
 0x2a6   :  { %730 = vmax.xlane.f32.xlu1 %v729_v61 }
 0x2a7   :  { %v726_v63 = vsel %vm725_vm0, %v723_v62, -inf }
 0x2a8   :  { %727 = vmax.xlane.f32.xlu0 %v726_v63 }
 0x32f   :  { %v731_v2 = vpop.xlane.xlu1 %730 }
 0x330   :  { %v733_v3 = vsub.f32 %v724_v59, %v731_v2 }
 0x331   :  { %v728_v4 = vpop.xlane.xlu0 %727 }
 0x332   :  { %v736_v0 = vmul.f32 1.442695, %v733_v3  ;;  %v732_v7 = vsub.f32 %v723_v62, %v728_v4 }
 0x334   :  { %3527 = vpow2.f32 %v736_v0  ;;  %v734_v8 = vmul.f32 1.442695, %v732_v7 }
 0x336   :  { %3529 = vpow2.f32 %v734_v8 }
 0x341   :  { %v3528_v9 = vpop.eup %3527 }
 0x342   :  { %v741_v1 = vsel %vm725_vm0, %v3528_v9, 0.0 }
 0x343   :  { %v3530_v10 = vpop.eup %3529  ;;  %742 = vadd.xlane.f32.xlu1 %v741_v1 }
 0x344   :  { %v738_v11 = vsel %vm725_vm0, %v3530_v10, 0.0 }
 0x345   :  { %739 = vadd.xlane.f32.xlu0 %v738_v11 }
 0x3cc   :  { %v743_v18 = vpop.xlane.xlu1 %742 }
 0x3cd   :  { %3531 = vrcp.f32 %v743_v18 }
 0x3ce   :  { %v740_v19 = vpop.xlane.xlu0 %739 }
 0x3cf   :  { %3533 = vrcp.f32 %v740_v19  ;;  %v3396_v19 = vld [vmem:[#allocation11 + $0x70] sm:$0xff]  }
 0x3da   :  { %v3532_v20 = vpop.eup %3531 }
 0x3db   :  { %v747_v28 = vmul.f32 %v3532_v20, %v3528_v9  ;;  %v3397_v20 = vld [vmem:[#allocation11 + $0x68] sm:$0xff]  }
 0x3dc   :  { %v3534_v24 = vpop.eup %3533 }
 0x3dd   :  { %v746_v27 = vmul.f32 %v3534_v24, %v3530_v10  ;;  %v3398_v24 = vld [vmem:[#allocation11 + $0x60] sm:$0xff]  }
 0x3df   :  { %v748_v30 = vpack.c.bf16 %v747_v28, %v746_v27  ;;  %v3400_v27 = vld [vmem:[#allocation11 + $0x50] sm:$0xff]   ;;  %v3401_v28 = vld [vmem:[#allocation11 + $0x48] sm:$0xff]  }
 0x3e1   :  { %3093 = vmatmul.mubr.msk.bf16.vlgmr.msra.gmra.mxu1 %vm725_vm0, %v748_v30  ;;  %v3402_v30 = vld [vmem:[#allocation11 + $0x40] sm:$0xff]  }
 0x3e2   :  { %3097 = vmatpush3.xpose.msra.mxu1 %v3963_v50  ;;  %3100 = vmatprep.mubr.f32.mxu1 %v554_v32 }
 0x3e3   :  { %3098 = vmatprep.subr.mxu1 %v3950_v33 }
 0x3e6   :  { %3099 = vmatpush3.xpose.msra.mxu1 %v3950_v33 }
 0x3e7   :  { %3103 = vmatprep.subr.bf16.mxu1 %v3794_v21 }
 0x3e9   :  { %3101 = vmatmul.mubr.f32.vlgmr.msra.gmra.mxu1 %v558_v39 }
 0x3ea   :  { %3104 = vmatpush3.bf16.msra.mxu1 %v913_v36  ;;  %3105 = vmatprep.mubr.msk.bf16.mxu1 %vm3795_vm1, %v3794_v21  ;;  %v2878_v36 = vld [vmem:[%s4209_s6] ss:$0 sm:$0xff] }
 0x3eb   :  { %3109 = vmatprep.subr.bf16.mxu1 %v3794_v21 }
 0x4a1   :  { %v787_v33 = vpop.f32.mrf.mxu1 }
 0x4a3   :  { %v3094_v41 = vpop.f32.mrf.mxu1 }
 0x4a5   :  { %v790_v43 = vpop.f32.mrf.mxu1 }
 0x4a6   :  { %v794_v44 = vpack.c.bf16 %v790_v43, %v787_v33 }
 0x4a7   :  { %v3095_v45 = vpop.f32.mrf.mxu1 }
 0x4a8   :  { %3146 = vmatmul.mubr.bf16.vlgmr.msra.gmra.mxu0 %v794_v44 }
 0x4a9   :  { %v3102_v46 = vpop.f32.mrf.mxu1  ;;  %3185 = vmatprep.mubr.msk.bf16.mxu0 %vm3795_vm1, %v3794_v21 }
 0x4aa   :  { %v887_v47 = vmul.f32 0.25, %v3102_v46 }
 0x4ab   :  { %v877_v48 = vpop.f32.mrf.mxu1 }
 0x4ac   :  { %v886_v49 = vmul.f32 0.25, %v877_v48  ;;  %v889_v50 = vadd.f32 %v887_v47, %v3966_v52 }
 0x4ae   :  { %v893_v51 = vsel %vm725_vm0, %v889_v50, -inf  ;;  %v888_v55 = vadd.f32 %v886_v49, %v3968_v57 }
 0x4af   :  { %894 = vmax.xlane.f32.xlu1 %v893_v51  ;;  %v3404_v51 = vld [vmem:[#allocation13 + $0x30] sm:$0xff]  }
 0x4b0   :  { %v890_v56 = vsel %vm725_vm0, %v888_v55, -inf }
 0x4b1   :  { %891 = vmax.xlane.f32.xlu0 %v890_v56  ;;  %v3407_v56 = vld [vmem:[#allocation13 + $0x18] sm:$0xff]  }
 0x538   :  { %v895_v58 = vpop.xlane.xlu1 %894 }
 0x539   :  { %v897_v59 = vsub.f32 %v889_v50, %v895_v58  ;;  %v3403_v50 = vld [vmem:[#allocation13 + $0x38] sm:$0xff]   ;;  %v3409_v58 = vld [vmem:[#allocation13 + $0x8] sm:$0xff]  }
 0x53a   :  { %v892_v61 = vpop.xlane.xlu0 %891 }
 0x53b   :  { %v900_v62 = vmul.f32 1.442695, %v897_v59  ;;  %v896_v63 = vsub.f32 %v888_v55, %v892_v61  ;;  %v3405_v55 = vld [vmem:[#allocation13 + $0x28] sm:$0xff]   ;;  %v3410_v59 = vld [vmem:[#allocation13] sm:$0xff]  }
 0x53d   :  { %3535 = vpow2.f32 %v900_v62  ;;  %v898_v2 = vmul.f32 1.442695, %v896_v63 }
 0x53f   :  { %3537 = vpow2.f32 %v898_v2 }
 0x54a   :  { %v3536_v3 = vpop.eup %3535 }
 0x54b   :  { %v905_v4 = vsel %vm725_vm0, %v3536_v3, 0.0 }
 0x54c   :  { %v3538_v0 = vpop.eup %3537  ;;  %906 = vadd.xlane.f32.xlu1 %v905_v4 }
 0x54d   :  { %v902_v7 = vsel %vm725_vm0, %v3538_v0, 0.0 }
 0x54e   :  { %903 = vadd.xlane.f32.xlu0 %v902_v7 }
 0x568   :  { %v1147_v8 = vpop.f32.mrf.mxu0 }
 0x56a   :  { %v3147_v9 = vpop.f32.mrf.mxu0 }
 0x56c   :  { %v1150_v1 = vpop.f32.mrf.mxu0 }
 0x56e   :  { %v3148_v10 = vpop.f32.mrf.mxu0 }
 0x5d5   :  { %v907_v11 = vpop.xlane.xlu1 %906 }
 0x5d6   :  { %3539 = vrcp.f32 %v907_v11 }
 0x5d7   :  { %v904_v12 = vpop.xlane.xlu0 %903 }
 0x5d8   :  { %3541 = vrcp.f32 %v904_v12 }
 0x5e3   :  { %v3540_v13 = vpop.eup %3539 }
 0x5e4   :  { %v911_v16 = vmul.f32 %v3540_v13, %v3536_v3  ;;  %v1165_v13 = vld [vmem:[%s4210_s7] sm:$0x3] }
 0x5e5   :  { %v3542_v14 = vpop.eup %3541 }
 0x5e6   :  { %v910_v15 = vmul.f32 %v3542_v14, %v3538_v0 }
 0x5e8   :  { %v912_v18 = vpack.c.bf16 %v911_v16, %v910_v15 }
 0x5ea   :  { %3106 = vmatmul.mubr.msk.bf16.vlgmr.msra.gmra.mxu1 %vm725_vm0, %v912_v18 }
 0x5eb   :  { %3110 = vmatpush3.bf16.msra.mxu1 %v3395_v17  ;;  %3125 = vmatprep.mubr.msk.bf16.mxu1 %vm3795_vm1, %v3794_v21  ;;  %v1195_v17 = vrot.slane %v1165_v13, %v3921_v54 }
 0x5ec   :  { %3111 = vmatprep.subr.bf16.mxu1 %v3794_v21 }
 0x5ef   :  { %3112 = vmatpush3.bf16.msra.mxu1 %v3396_v19 }
 0x5f0   :  { %3113 = vmatprep.subr.bf16.mxu1 %v3794_v21 }
 0x5f3   :  { %3114 = vmatpush3.bf16.msra.mxu1 %v3397_v20 }
 0x5f4   :  { %3115 = vmatprep.subr.bf16.mxu1 %v3794_v21 }
 0x5f7   :  { %3116 = vmatpush3.bf16.msra.mxu1 %v3398_v24 }
 0x5f8   :  { %3117 = vmatprep.subr.bf16.mxu1 %v3794_v21 }
 0x5fb   :  { %3118 = vmatpush3.bf16.msra.mxu1 %v3399_v26  ;;  %v1201_v26 = vrot.slane %v1165_v13, %v3926_v60 }
 0x5fc   :  { %3119 = vmatprep.subr.bf16.mxu1 %v3794_v21 }
 0x5ff   :  { %3120 = vmatpush3.bf16.msra.mxu1 %v3400_v27 }
 0x600   :  { %3121 = vmatprep.subr.bf16.mxu1 %v3794_v21 }
 0x603   :  { %3122 = vmatpush3.bf16.msra.mxu1 %v3401_v28 }
 0x604   :  { %3123 = vmatprep.subr.bf16.mxu1 %v3794_v21 }
 0x607   :  { %3124 = vmatpush3.bf16.msra.mxu1 %v3402_v30 }
 0x608   :  { %3149 = vmatprep.subr.bf16.mxu1 %v3794_v21 }
 0x6aa   :  { %v951_v32 = vpop.f32.mrf.mxu1 }
 0x6ac   :  { %v3107_v34 = vpop.f32.mrf.mxu1 }
 0x6ad   :  { %v3411_v34 = vld [vmem:[#allocation14 + $0x38] sm:$0xff]  }
 0x6ae   :  { %v954_v35 = vpop.f32.mrf.mxu1  ;;  %3170 = vmatpush3.bf16.msra.mxu0 %v3411_v34  ;;  %v3433_v34 = vld [vmem:[#allocation8 + $0x274] ss:$24 sps:$4 sm:$0xff]  }
 0x6af   :  { %v958_v37 = vpack.c.bf16 %v954_v35, %v951_v32  ;;  %3171 = vmatprep.subr.bf16.mxu0 %v3794_v21  ;;  %v3412_v35 = vld [vmem:[#allocation14 + $0x30] sm:$0xff]  }
 0x6b0   :  { %v3108_v38 = vpop.f32.mrf.mxu1 }
 0x6b1   :  { %3126 = vmatmul.mubr.bf16.vlgmr.msra.gmra.mxu1 %v958_v37  ;;  %v3413_v37 = vld [vmem:[#allocation14 + $0x28] sm:$0xff]   ;;  %v3414_v38 = vld [vmem:[#allocation14 + $0x20] sm:$0xff]  }
 0x6b2   :  { %3165 = vmatprep.mubr.msk.bf16.mxu1 %vm3795_vm1, %v3794_v21  ;;  %3150 = vmatpush3.bf16.msra.mxu1 %v3403_v50 }
 0x6b3   :  { %3151 = vmatprep.subr.bf16.mxu1 %v3794_v21  ;;  %3172 = vmatpush3.bf16.msra.mxu0 %v3412_v35  ;;  %v3431_v35 = vld [vmem:[#allocation8 + $0x270] ss:$24 sps:$4 sm:$0xff]  }
 0x6b4   :  { %3173 = vmatprep.subr.bf16.mxu0 %v3794_v21 }
 0x6b6   :  { %3152 = vmatpush3.bf16.msra.mxu1 %v3404_v51 }
 0x6b7   :  { %3153 = vmatprep.subr.bf16.mxu1 %v3794_v21  ;;  %3174 = vmatpush3.bf16.msra.mxu0 %v3413_v37  ;;  %v3436_v37 = vld [vmem:[#allocation8 + $0x27c] ss:$24 sps:$4 sm:$0xff]  }
 0x6b8   :  { %3175 = vmatprep.subr.bf16.mxu0 %v3794_v21 }
 0x6ba   :  { %3154 = vmatpush3.bf16.msra.mxu1 %v3405_v55 }
 0x6bb   :  { %3155 = vmatprep.subr.bf16.mxu1 %v3794_v21  ;;  %3176 = vmatpush3.bf16.msra.mxu0 %v3414_v38  ;;  %v3434_v38 = vld [vmem:[#allocation8 + $0x278] ss:$24 sps:$4 sm:$0xff]  }
 0x6bc   :  { %3177 = vmatprep.subr.bf16.mxu0 %v3794_v21 }
 0x771   :  { %v1058_v39 = vpop.f32.mrf.mxu1 }
 0x772   :  { %v1148_v22 = vadd.f32 %v1147_v8, %v1058_v39  ;;  %v3415_v39 = vld [vmem:[#allocation14 + $0x18] sm:$0xff]  }
 0x773   :  { %v3127_v42 = vpop.f32.mrf.mxu1  ;;  %3178 = vmatpush3.bf16.msra.mxu0 %v3415_v39  ;;  %v3437_v39 = vld [vmem:[#allocation8 + $0x240] ss:$24 sps:$4 sm:$0xff]  }
 0x774   :  { %v1161_v33 = vadd.f32 %v2878_v36, %v1148_v22  ;;  %3179 = vmatprep.subr.bf16.mxu0 %v3794_v21  ;;  %v3417_v22 = vld [vmem:[#allocation14 + $0x8] sm:$0xff]   ;;  %v3418_v42 = vld [vmem:[#allocation14] sm:$0xff]  }
 0x775   :  { %v1061_v41 = vpop.f32.mrf.mxu1 }
 0x776   :  { %v1151_v43 = vadd.f32 %v1150_v1, %v1061_v41  ;;  %v1163_v44 = vadd.f32 %v1161_v33, %v3930_v5  ;;  %v3406_v5 = vld [vmem:[#allocation13 + $0x20] sm:$0xff]   ;;  %v2879_v33 = vld [vmem:[%s4212_s9] ss:$0 sm:$0xff] }
 0x777   :  { %v3128_v45 = vpop.f32.mrf.mxu1  ;;  %3156 = vmatpush3.bf16.msra.mxu1 %v3406_v5 }
 0x778   :  { %v1162_v46 = vadd.f32 %v2878_v36, %v1151_v43  ;;  %1166 = vadd.xlane.f32.xlu0 %v1163_v44  ;;  %v1172_v47 = vmul.f32 %v1163_v44, %v1163_v44  ;;  %3157 = vmatprep.subr.bf16.mxu1 %v3794_v21  ;;  %v3416_v36 = vld [vmem:[#allocation14 + $0x10] sm:$0xff]  }
 0x779   :  { %3180 = vmatpush3.bf16.msra.mxu0 %v3416_v36  ;;  %v3439_v36 = vld [vmem:[#allocation8 + $0x244] ss:$24 sps:$4 sm:$0xff]  }
 0x77a   :  { %v1164_v48 = vadd.f32 %v1162_v46, %v3932_v6  ;;  %v3408_v6 = vld [vmem:[#allocation13 + $0x10] sm:$0xff]   ;;  %3181 = vmatprep.subr.bf16.mxu0 %v3794_v21 }
 0x77b   :  { %3158 = vmatpush3.bf16.msra.mxu1 %v3407_v56 }
 0x77c   :  { %1174 = vadd.xlane.f32.xlu0 %v1172_v47  ;;  %1168 = vadd.xlane.f32.xlu1 %v1164_v48  ;;  %v1173_v49 = vmul.f32 %v1164_v48, %v1164_v48 }
 0x77d   :  { %3159 = vmatprep.subr.bf16.mxu1 %v3794_v21  ;;  %3182 = vmatpush3.bf16.msra.mxu0 %v3417_v22  ;;  %v3440_v22 = vld [vmem:[#allocation8 + $0x248] ss:$24 sps:$4 sm:$0xff]  }
 0x77e   :  { %3183 = vmatprep.subr.bf16.mxu0 %v3794_v21 }
 0x77f   :  { %3160 = vmatpush3.bf16.msra.mxu1 %v3408_v6 }
 0x780   :  { %1176 = vadd.xlane.f32.xlu1 %v1173_v49  ;;  %3161 = vmatprep.subr.bf16.mxu1 %v3794_v21 }
 0x781   :  { %3184 = vmatpush3.bf16.msra.mxu0 %v3418_v42  ;;  %v3442_v42 = vld [vmem:[#allocation8 + $0x24c] ss:$24 sps:$4 sm:$0xff]  }
 0x783   :  { %3162 = vmatpush3.bf16.msra.mxu1 %v3409_v58 }
 0x784   :  { %3163 = vmatprep.subr.bf16.mxu1 %v3794_v21 }
 0x787   :  { %3164 = vmatpush3.bf16.msra.mxu1 %v3410_v59 }
 0x801   :  { %v1167_v61 = vpop.xlane.xlu0 %1166 }
 0x802   :  { %v1170_v62 = vmul.f32 0.03125, %v1167_v61 }
 0x804   :  { %v1180_v3 = vmul.f32 %v1170_v62, %v1170_v62  ;;  %v1184_v14 = vsub.f32 %v1163_v44, %v1170_v62 }
 0x805   :  { %v1175_v63 = vpop.xlane.xlu0 %1174  ;;  %v1169_v2 = vpop.xlane.xlu1 %1168 }
 0x806   :  { %v1178_v4 = vmul.f32 0.03125, %v1175_v63  ;;  %v1171_v0 = vmul.f32 0.03125, %v1169_v2 }
 0x808   :  { %v1182_v7 = vsub.f32 %v1178_v4, %v1180_v3  ;;  %v1181_v1 = vmul.f32 %v1171_v0, %v1171_v0  ;;  %v1185_v18 = vsub.f32 %v1164_v48, %v1171_v0 }
 0x809   :  { %v1177_v8 = vpop.xlane.xlu1 %1176 }
 0x80a   :  { %v1186_v9 = vadd.f32 1e-12, %v1182_v7  ;;  %v1179_v10 = vmul.f32 0.03125, %v1177_v8 }
 0x80c   :  { %3543 = vrsqrt.f32 %v1186_v9  ;;  %v1183_v11 = vsub.f32 %v1179_v10, %v1181_v1  ;;  %v2888_v9 = vld [vmem:[%s4214_s11] ss:$0 sm:$0xff] }
 0x80e   :  { %v1187_v12 = vadd.f32 1e-12, %v1183_v11 }
 0x810   :  { %3545 = vrsqrt.f32 %v1187_v12 }
 0x819   :  { %v3544_v15 = vpop.eup %3543 }
 0x81a   :  { %v1190_v16 = vmul.f32 %v3544_v15, %v1184_v14 }
 0x81c   :  { %v1196_v24 = vmul.f32 %v1195_v17, %v1190_v16 }
 0x81d   :  { %v3546_v19 = vpop.eup %3545 }
 0x81e   :  { %v1191_v20 = vmul.f32 %v3546_v19, %v1185_v18  ;;  %v1202_v28 = vadd.f32 %v1201_v26, %v1196_v24  ;;  %v3419_v19 = vld [vmem:[#allocation8 + $0x2d0] ss:$24 sps:$4 sm:$0xff]   ;;  %v3424_v24 = vld [vmem:[#allocation8 + $0x2dc] ss:$24 sps:$4 sm:$0xff]  }
 0x81f   :  { %1855 = vmatprep.subr.bf16.mxu0 %v3424_v24 }
 0x820   :  { %v1197_v27 = vmul.f32 %v1195_v17, %v1191_v20  ;;  %v3421_v20 = vld [vmem:[#allocation8 + $0x2d4] ss:$24 sps:$4 sm:$0xff]  }
 0x821   :  { %1812 = vmatprep.subr.bf16.mxu1 %v3421_v20 }
 0x822   :  { %v4043_v30 = vadd.f32 %v1201_v26, %v1197_v27  ;;  %v3422_v26 = vld [vmem:[#allocation8 + $0x2d8] ss:$24 sps:$4 sm:$0xff]   ;;  %v3427_v27 = vld [vmem:[#allocation8 + $0x2a4] ss:$24 sps:$4 sm:$0xff]  }
 0x824   :  { %v1204_v32 = vpack.c.bf16 %v4043_v30, %v1202_v28 }
 0x826   :  { %3166 = vmatmul.mubr.bf16.vlgmr.msra.gmra.mxu1 %v1204_v32  ;;  %v3428_v32 = vld [vmem:[#allocation8 + $0x2a8] ss:$24 sps:$4 sm:$0xff]  }
 0x827   :  { %1844 = vmatprep.mubr.bf16.mxu1 %v3793_v31  ;;  %1813 = vmatpush1.bf16.msra.mxu1 %v3419_v19 }
 0x828   :  { %1814 = vmatprep.subr.bf16.mxu1 %v3427_v27 }
 0x8e6   :  { %v1310_v41 = vpop.f32.mrf.mxu1 }
 0x8e7   :  { %v1311_v43 = vadd.f32 %v2879_v33, %v1310_v41  ;;  %v3448_v41 = vld [vmem:[#allocation8 + $0x21c] ss:$24 sps:$4 sm:$0xff]  }
 0x8e8   :  { %v3167_v44 = vpop.f32.mrf.mxu1 }
 0x8e9   :  { %v1317_v45 = vmul.f32 %v1311_v43, %v1311_v43  ;;  %v3446_v44 = vld [vmem:[#allocation8 + $0x218] ss:$24 sps:$4 sm:$0xff]  }
 0x8ea   :  { %v1313_v46 = vpop.f32.mrf.mxu1 }
 0x8eb   :  { %v1319_v47 = vmul.f32 %v1317_v45, %v1311_v43  ;;  %v1314_v48 = vadd.f32 %v2879_v33, %v1313_v46  ;;  %v3445_v33 = vld [vmem:[#allocation8 + $0x214] ss:$24 sps:$4 sm:$0xff]   ;;  %v3451_v45 = vld [vmem:[#allocation8 + $0x1e4] ss:$24 sps:$4 sm:$0xff]  }
 0x8ec   :  { %v3168_v49 = vpop.f32.mrf.mxu1  ;;  %v3454_v46 = vld [vmem:[#allocation8 + $0x1ec] ss:$24 sps:$4 sm:$0xff]  }
 0x8ed   :  { %v1321_v50 = vmul.f32 0.044715, %v1319_v47  ;;  %v1318_v51 = vmul.f32 %v1314_v48, %v1314_v48  ;;  %v3449_v47 = vld [vmem:[#allocation8 + $0x1e0] ss:$24 sps:$4 sm:$0xff]   ;;  %v3457_v49 = vld [vmem:[#allocation8 + $0x1b4] ss:$24 sps:$4 sm:$0xff]  }
 0x8ef   :  { %v1323_v55 = vadd.f32 %v1321_v50, %v1311_v43  ;;  %v1320_v5 = vmul.f32 %v1318_v51, %v1314_v48  ;;  %v3460_v50 = vld [vmem:[#allocation8 + $0x1bc] ss:$24 sps:$4 sm:$0xff]   ;;  %v3455_v51 = vld [vmem:[#allocation8 + $0x1b0] ss:$24 sps:$4 sm:$0xff]  }
 0x8f1   :  { %v1325_v56 = vmul.f32 0.7978846, %v1323_v55  ;;  %v1322_v6 = vmul.f32 0.044715, %v1320_v5  ;;  %v3458_v55 = vld [vmem:[#allocation8 + $0x1b8] ss:$24 sps:$4 sm:$0xff]  }
 0x8f2   :  { %v3463_v5 = vld [vmem:[#allocation8 + $0x184] ss:$24 sps:$4 sm:$0xff]  }
 0x8f3   :  { %3547 = vtanh.f32 %v1325_v56  ;;  %v1324_v58 = vadd.f32 %v1322_v6, %v1314_v48  ;;  %v3466_v56 = vld [vmem:[#allocation8 + $0x18c] ss:$24 sps:$4 sm:$0xff]   ;;  %v3461_v6 = vld [vmem:[#allocation8 + $0x180] ss:$24 sps:$4 sm:$0xff]  }
 0x8f5   :  { %v1326_v59 = vmul.f32 0.7978846, %v1324_v58  ;;  %v3464_v58 = vld [vmem:[#allocation8 + $0x188] ss:$24 sps:$4 sm:$0xff]  }
 0x8f7   :  { %3549 = vtanh.f32 %v1326_v59  ;;  %v3469_v59 = vld [vmem:[#allocation8 + $0x2e4] ss:$24 sps:$4 sm:$0xff]  }
 0x900   :  { %v3548_v61 = vpop.eup %3547 }
 0x901   :  { %v1329_v62 = vadd.f32 1.0, %v3548_v61 }
 0x903   :  { %v1331_v2 = vmul.f32 0.5, %v1329_v62 }
 0x904   :  { %v3550_v63 = vpop.eup %3549 }
 0x905   :  { %v1330_v3 = vadd.f32 1.0, %v3550_v63  ;;  %v1333_v0 = vmul.f32 %v1331_v2, %v1311_v43  ;;  %v3443_v43 = vld [vmem:[#allocation8 + $0x210] ss:$24 sps:$4 sm:$0xff]  }
 0x907   :  { %v1332_v4 = vmul.f32 0.5, %v1330_v3 }
 0x909   :  { %v1334_v7 = vmul.f32 %v1332_v4, %v1314_v48  ;;  %v3452_v48 = vld [vmem:[#allocation8 + $0x1e8] ss:$24 sps:$4 sm:$0xff]  }
 0x90b   :  { %v1335_v8 = vpack.c.bf16 %v1334_v7, %v1333_v0 }
 0x90d   :  { %3186 = vmatmul.mubr.bf16.vlgmr.msra.gmra.mxu0 %v1335_v8 }
 0x90e   :  { %1887 = vmatprep.mubr.bf16.mxu0 %v3793_v31  ;;  %1856 = vmatpush1.bf16.msra.mxu0 %v3422_v26 }
 0x9cd   :  { %v1441_v1 = vpop.f32.mrf.mxu0 }
 0x9ce   :  { %v1442_v10 = vadd.f32 %v2888_v9, %v1441_v1 }
 0x9cf   :  { %v3187_v11 = vpop.f32.mrf.mxu0 }
 0x9d0   :  { %v4061_v12 = vadd.f32 %v1442_v10, %v1202_v28  ;;  %v3425_v28 = vld [vmem:[#allocation8 + $0x2a0] ss:$24 sps:$4 sm:$0xff]  }
 0x9d1   :  { %v1444_v13 = vpop.f32.mrf.mxu0  ;;  %1815 = vmatpush1.bf16.msra.mxu1 %v3425_v28 }
 0x9d2   :  { %v1445_v14 = vadd.f32 %v2888_v9, %v1444_v13  ;;  %1451 = vadd.xlane.f32.xlu0 %v4061_v12  ;;  %v1457_v17 = vmul.f32 %v4061_v12, %v4061_v12  ;;  %1816 = vmatprep.subr.bf16.mxu1 %v3433_v34 }
 0x9d3   :  { %v3188_v15 = vpop.f32.mrf.mxu0 }
 0x9d4   :  { %v4065_v16 = vadd.f32 %v1445_v14, %v4043_v30  ;;  %v3430_v30 = vld [vmem:[#allocation8 + $0x2ac] ss:$24 sps:$4 sm:$0xff]   ;;  %v1450_v14 = vld [vmem:[%s4215_s12] sm:$0x3] }
 0x9d5   :  { %1857 = vmatprep.subr.bf16.mxu0 %v3430_v30  ;;  %1817 = vmatpush1.bf16.msra.mxu1 %v3431_v35  ;;  %v1480_v19 = vrot.slane %v1450_v14, %v3921_v54  ;;  %v1486_v28 = vrot.slane %v1450_v14, %v3926_v60  ;;  %v3467_v35 = vld [vmem:[#allocation8 + $0x2e0] ss:$24 sps:$4 sm:$0xff]  }
 0x9d6   :  { %1459 = vadd.xlane.f32.xlu0 %v1457_v17  ;;  %1453 = vadd.xlane.f32.xlu1 %v4065_v16  ;;  %v1458_v18 = vmul.f32 %v4065_v16, %v4065_v16 }
 0x9d7   :  { %1858 = vmatpush1.bf16.msra.mxu0 %v3428_v32  ;;  %1818 = vmatprep.subr.bf16.mxu1 %v3439_v36  ;;  %v3478_v36 = vld [vmem:[#allocation8 + $0x254] ss:$24 sps:$4 sm:$0xff]  }
 0x9d8   :  { %1859 = vmatprep.subr.bf16.mxu0 %v3436_v37  ;;  %v3472_v37 = vld [vmem:[#allocation8 + $0x2b4] ss:$24 sps:$4 sm:$0xff]  }
 0x9d9   :  { %1819 = vmatpush1.bf16.msra.mxu1 %v3437_v39  ;;  %v3473_v39 = vld [vmem:[#allocation8 + $0x280] ss:$24 sps:$4 sm:$0xff]  }
 0x9da   :  { %1461 = vadd.xlane.f32.xlu1 %v1458_v18  ;;  %1820 = vmatprep.subr.bf16.mxu1 %v3445_v33  ;;  %v3479_v33 = vld [vmem:[#allocation8 + $0x220] ss:$24 sps:$4 sm:$0xff]  }
 0x9db   :  { %1860 = vmatpush1.bf16.msra.mxu0 %v3434_v38  ;;  %v3470_v38 = vld [vmem:[#allocation8 + $0x2b0] ss:$24 sps:$4 sm:$0xff]  }
 0x9dc   :  { %1861 = vmatprep.subr.bf16.mxu0 %v3442_v42  ;;  %v3481_v42 = vld [vmem:[#allocation8 + $0x224] ss:$24 sps:$4 sm:$0xff]  }
 0x9dd   :  { %1821 = vmatpush1.bf16.msra.mxu1 %v3443_v43  ;;  %v3482_v43 = vld [vmem:[#allocation8 + $0x1f0] ss:$24 sps:$4 sm:$0xff]  }
 0x9de   :  { %1822 = vmatprep.subr.bf16.mxu1 %v3451_v45  ;;  %v3490_v45 = vld [vmem:[#allocation8 + $0x194] ss:$24 sps:$4 sm:$0xff]  }
 0x9df   :  { %1862 = vmatpush1.bf16.msra.mxu0 %v3440_v22  ;;  %v3476_v22 = vld [vmem:[#allocation8 + $0x250] ss:$24 sps:$4 sm:$0xff]  }
 0x9e0   :  { %1863 = vmatprep.subr.bf16.mxu0 %v3448_v41  ;;  %v3484_v41 = vld [vmem:[#allocation8 + $0x1f4] ss:$24 sps:$4 sm:$0xff]  }
 0x9e1   :  { %1823 = vmatpush1.bf16.msra.mxu1 %v3449_v47  ;;  %v4089_v47 = vld [vmem:[#allocation10 + $0x6] sm:$0x3f] }
 0x9e2   :  { %1824 = vmatprep.subr.bf16.mxu1 %v3457_v49  ;;  %v1557_v49 = vrot.slane %v4089_v47, %v261_v23 }
 0x9e3   :  { %1864 = vmatpush1.bf16.msra.mxu0 %v3446_v44  ;;  %v3487_v44 = vld [vmem:[#allocation8 + $0x1c4] ss:$24 sps:$4 sm:$0xff]  }
 0x9e4   :  { %1865 = vmatprep.subr.bf16.mxu0 %v3454_v46  ;;  %v3488_v46 = vld [vmem:[#allocation8 + $0x190] ss:$24 sps:$4 sm:$0xff]  }
 0x9e5   :  { %1825 = vmatpush1.bf16.msra.mxu1 %v3455_v51 }
 0x9e6   :  { %1826 = vmatprep.subr.bf16.mxu1 %v3463_v5 }
 0x9e7   :  { %1866 = vmatpush1.bf16.msra.mxu0 %v3452_v48  ;;  %v1545_v48 = vrot.slane %v4089_v47, %v3921_v54 }
 0x9e8   :  { %1867 = vmatprep.subr.bf16.mxu0 %v3460_v50 }
 0x9e9   :  { %1827 = vmatpush1.bf16.msra.mxu1 %v3461_v6 }
 0x9ea   :  { %1898 = vmatprep.subr.bf16.mxu1 %v3469_v59 }
 0x9eb   :  { %1868 = vmatpush1.bf16.msra.mxu0 %v3458_v55 }
 0x9ec   :  { %1869 = vmatprep.subr.bf16.mxu0 %v3466_v56  ;;  %v1553_v56 = vrot.slane %v4089_v47, %v257_v25 }
 0x9ef   :  { %1870 = vmatpush1.bf16.msra.mxu0 %v3464_v58 }
 0xa5b   :  { %v1452_v61 = vpop.xlane.xlu0 %1451 }
 0xa5c   :  { %v1455_v62 = vmul.f32 0.03125, %v1452_v61 }
 0xa5e   :  { %v1465_v3 = vmul.f32 %v1455_v62, %v1455_v62  ;;  %v1469_v15 = vsub.f32 %v4061_v12, %v1455_v62 }
 0xa5f   :  { %v1460_v63 = vpop.xlane.xlu0 %1459  ;;  %v1454_v2 = vpop.xlane.xlu1 %1453 }
 0xa60   :  { %v1463_v4 = vmul.f32 0.03125, %v1460_v63  ;;  %v1456_v0 = vmul.f32 0.03125, %v1454_v2 }
 0xa62   :  { %v1467_v7 = vsub.f32 %v1463_v4, %v1465_v3  ;;  %v1466_v1 = vmul.f32 %v1456_v0, %v1456_v0  ;;  %v1470_v20 = vsub.f32 %v4065_v16, %v1456_v0  ;;  %v3475_v16 = vld [vmem:[#allocation8 + $0x284] ss:$24 sps:$4 sm:$0xff]   ;;  %v1561_v3 = vrot.slane %v4089_v47, %v265_v40 }
 0xa63   :  { %v1462_v8 = vpop.xlane.xlu1 %1461 }
 0xa64   :  { %v1471_v9 = vadd.f32 1e-12, %v1467_v7  ;;  %v1464_v10 = vmul.f32 0.03125, %v1462_v8 }
 0xa66   :  { %3551 = vrsqrt.f32 %v1471_v9  ;;  %v1468_v11 = vsub.f32 %v1464_v10, %v1466_v1 }
 0xa68   :  { %v1472_v13 = vadd.f32 1e-12, %v1468_v11 }
 0xa6a   :  { %3553 = vrsqrt.f32 %v1472_v13 }
 0xa73   :  { %v3552_v17 = vpop.eup %3551 }
 0xa74   :  { %v1475_v18 = vmul.f32 %v3552_v17, %v1469_v15 }
 0xa76   :  { %v1481_v27 = vmul.f32 %v1480_v19, %v1475_v18 }
 0xa77   :  { %v3554_v24 = vpop.eup %3553 }
 0xa78   :  { %v1476_v26 = vmul.f32 %v3554_v24, %v1470_v20  ;;  %v4079_v32 = vadd.f32 %v1486_v28, %v1481_v27 }
 0xa7a   :  { %v1482_v30 = vmul.f32 %v1480_v19, %v1476_v26 }
 0xa7c   :  { %v4081_v34 = vadd.f32 %v1486_v28, %v1482_v30 }
 0xa7e   :  { %v1489_v12 = vpack.c.bf16 %v4081_v34, %v4079_v32 }
 0xa80   :  { %1845 = vmatmul.mubr.bf16.vlgmr.msra.gmra.mxu1 %v1489_v12  ;;  %1888 = vmatmul.mubr.bf16.vlgmr.msra.gmra.mxu0 %v1489_v12 }
 0xa81   :  { %1899 = vmatpush1.bf16.msra.mxu1 %v3467_v35  ;;  %1930 = vmatprep.mubr.bf16.mxu1 %v3793_v31  ;;  %v3485_v31 = vld [vmem:[#allocation8 + $0x1c0] ss:$24 sps:$4 sm:$0xff]  }
 0xa82   :  { %1900 = vmatprep.subr.bf16.mxu1 %v3472_v37 }
 0xa85   :  { %1901 = vmatpush1.bf16.msra.mxu1 %v3470_v38  ;;  %v3492_v38 = vld [vmem:[#allocation11 + $0xb0] sm:$0xff]  }
 0xa86   :  { %1902 = vmatprep.subr.bf16.mxu1 %v3475_v16  ;;  %v3493_v16 = vld [vmem:[#allocation11 + $0xa8] sm:$0xff]  }
 0xa89   :  { %1903 = vmatpush1.bf16.msra.mxu1 %v3473_v39  ;;  %v3494_v39 = vld [vmem:[#allocation11 + $0xa0] sm:$0xff]  }
 0xa8a   :  { %1904 = vmatprep.subr.bf16.mxu1 %v3478_v36  ;;  %v3495_v36 = vld [vmem:[#allocation11 + $0x98] sm:$0xff]  }
 0xa8d   :  { %1905 = vmatpush1.bf16.msra.mxu1 %v3476_v22  ;;  %v3496_v22 = vld [vmem:[#allocation11 + $0x90] sm:$0xff]  }
 0xa8e   :  { %1906 = vmatprep.subr.bf16.mxu1 %v3481_v42 }
 0xa91   :  { %1907 = vmatpush1.bf16.msra.mxu1 %v3479_v33 }
 0xa92   :  { %1908 = vmatprep.subr.bf16.mxu1 %v3484_v41 }
 0xa95   :  { %1909 = vmatpush1.bf16.msra.mxu1 %v3482_v43 }
 0xa96   :  { %1910 = vmatprep.subr.bf16.mxu1 %v3487_v44  ;;  %v1549_v44 = vrot.slane %v4089_v47, %v3926_v60 }
 0xa99   :  { %1911 = vmatpush1.bf16.msra.mxu1 %v3485_v31 }
 0xa9a   :  { %1912 = vmatprep.subr.bf16.mxu1 %v3490_v45 }
 0xa9d   :  { %1913 = vmatpush1.bf16.msra.mxu1 %v3488_v46 }
 0xa9e   :  { %3235 = vmatprep.subr.bf16.mxu1 %v3794_v21 }
 0xaa0   :  { %1931 = vmatmul.mubr.bf16.vlgmr.msra.gmra.mxu1 %v1489_v12 }
 0xaa1   :  { %3251 = vmatprep.mubr.msk.bf16.mxu1 %vm3795_vm1, %v3794_v21 }
 0xb40   :  { %v1846_v50 = vpop.f32.mrf.mxu1  ;;  %v1889_v51 = vpop.f32.mrf.mxu0 }
 0xb41   :  { %v1847_v55 = vadd.f32 %v1846_v50, %v1545_v48  ;;  %v1890_v62 = vadd.f32 %v1889_v51, %v1553_v56  ;;  %v1565_v50 = vrot.slane %v4089_v47, %v269_v29  ;;  %v3498_v29 = vld [vmem:[#allocation11 + $0x80] sm:$0xff]  }
 0xb42   :  { %v1891_v5 = vpop.f32.mrf.mxu0  ;;  %v4101_v61 = vpop.f32.mrf.mxu1 }
 0xb43   :  { %v4099_v6 = vadd.f32 %v1891_v5, %v1557_v49  ;;  %3193 = vmatprep.mubr.f32.mxu0 %v1847_v55 }
 0xb44   :  { %v1893_v58 = vpop.f32.mrf.mxu0  ;;  %v1850_v23 = vpop.f32.mrf.mxu1 }
 0xb45   :  { %v1894_v59 = vadd.f32 %v1893_v58, %v1553_v56  ;;  %v1851_v63 = vadd.f32 %v1850_v23, %v1545_v48  ;;  %v1849_v48 = vadd.f32 %v4101_v61, %v1549_v44 }
 0xb46   :  { %v4106_v25 = vpop.f32.mrf.mxu1  ;;  %v1895_v7 = vpop.f32.mrf.mxu0 }
 0xb47   :  { %3189 = vmatprep.subr.mxu0 %v1894_v59  ;;  %v1896_v10 = vadd.f32 %v1895_v7, %v1557_v49  ;;  %v1853_v5 = vadd.f32 %v4106_v25, %v1549_v44 }
 0xb48   :  { %3190 = vmatpush3.xpose.msra.mxu0 %v1894_v59 }
 0xb49   :  { %3191 = vmatprep.subr.mxu0 %v1890_v62 }
 0xb4c   :  { %3192 = vmatpush3.xpose.msra.mxu0 %v1890_v62 }
 0xb4d   :  { %3196 = vmatprep.subr.bf16.mxu0 %v3794_v21 }
 0xb4f   :  { %3194 = vmatmul.mubr.f32.vlgmr.msra.gmra.mxu0 %v1851_v63 }
 0xb50   :  { %3198 = vmatprep.mubr.msk.bf16.mxu0 %vm3795_vm1, %v3794_v21 }
 0xb60   :  { %v1932_v2 = vpop.f32.mrf.mxu1 }
 0xb61   :  { %v1933_v8 = vadd.f32 %v1932_v2, %v1561_v3  ;;  %v3583_v2 = vld [vmem:[#allocation5 + $0x8] sm:$0xff] }
 0xb62   :  { %v4111_v4 = vpop.f32.mrf.mxu1 }
 0xb63   :  { %v1935_v55 = vadd.f32 %v4111_v4, %v1565_v50 }
 0xb64   :  { %v1936_v0 = vpop.f32.mrf.mxu1 }
 0xb65   :  { %v1937_v9 = vadd.f32 %v1936_v0, %v1561_v3  ;;  %v3584_v0 = vld [vmem:[#allocation5] sm:$0xff] }
 0xb66   :  { %v1938_v49 = vpop.f32.mrf.mxu1 }
 0xb67   :  { %v2043_v1 = vpack.c.bf16 %v1937_v9, %v1933_v8  ;;  %v1939_v51 = vadd.f32 %v1938_v49, %v1565_v50 }
 0xb69   :  { %3197 = vmatpush3.bf16.msra.mxu0 %v2043_v1  ;;  %v2208_v56 = vpack.c.bf16 %v1939_v51, %v1935_v55 }
 0xb6a   :  { %3202 = vmatprep.subr.mxu0 %v1896_v10 }
 0xc0f   :  { %v3195_v11 = vpop.f32.mrf.mxu0 }
 0xc10   :  { %v2017_v13 = vmul.f32 0.25, %v3195_v11 }
 0xc11   :  { %v2007_v14 = vpop.f32.mrf.mxu0 }
 0xc12   :  { %v2016_v15 = vmul.f32 0.25, %v2007_v14  ;;  %v2019_v17 = vadd.f32 %v2017_v13, %v3966_v52 }
 0xc14   :  { %v2023_v18 = vsel %vm725_vm0, %v2019_v17, -inf  ;;  %v2018_v40 = vadd.f32 %v2016_v15, %v3968_v57  ;;  %v3491_v57 = vld [vmem:[#allocation11 + $0xb8] sm:$0xff]  }
 0xc15   :  { %2024 = vmax.xlane.f32.xlu1 %v2023_v18  ;;  %3236 = vmatpush3.bf16.msra.mxu1 %v3491_v57 }
 0xc16   :  { %v2020_v19 = vsel %vm725_vm0, %v2018_v40, -inf  ;;  %3237 = vmatprep.subr.bf16.mxu1 %v3794_v21 }
 0xc17   :  { %2021 = vmax.xlane.f32.xlu0 %v2020_v19 }
 0xc19   :  { %3238 = vmatpush3.bf16.msra.mxu1 %v3492_v38  ;;  %v3500_v38 = vld [vmem:[#allocation11 + $0xf0] sm:$0xff]  }
 0xc1a   :  { %3239 = vmatprep.subr.bf16.mxu1 %v3794_v21 }
 0xc1d   :  { %3240 = vmatpush3.bf16.msra.mxu1 %v3493_v16  ;;  %v3501_v16 = vld [vmem:[#allocation11 + $0xe8] sm:$0xff]  }
 0xc1e   :  { %3241 = vmatprep.subr.bf16.mxu1 %v3794_v21 }
 0xc21   :  { %3242 = vmatpush3.bf16.msra.mxu1 %v3494_v39  ;;  %v3502_v39 = vld [vmem:[#allocation11 + $0xe0] sm:$0xff]  }
 0xc22   :  { %3243 = vmatprep.subr.bf16.mxu1 %v3794_v21 }
 0xc25   :  { %3244 = vmatpush3.bf16.msra.mxu1 %v3495_v36  ;;  %v3503_v36 = vld [vmem:[#allocation11 + $0xd8] sm:$0xff]  }
 0xc26   :  { %3245 = vmatprep.subr.bf16.mxu1 %v3794_v21 }
 0xc29   :  { %3246 = vmatpush3.bf16.msra.mxu1 %v3496_v22  ;;  %v3504_v22 = vld [vmem:[#allocation11 + $0xd0] sm:$0xff]  }
 0xc2a   :  { %3247 = vmatprep.subr.bf16.mxu1 %v3794_v21 }
 0xc2d   :  { %3248 = vmatpush3.bf16.msra.mxu1 %v3497_v53 }
 0xc2e   :  { %3249 = vmatprep.subr.bf16.mxu1 %v3794_v21 }
 0xc31   :  { %3250 = vmatpush3.bf16.msra.mxu1 %v3498_v29 }
 0xc32   :  { %3275 = vmatprep.subr.bf16.mxu1 %v3794_v21 }
 0xc9e   :  { %v2025_v20 = vpop.xlane.xlu1 %2024 }
 0xc9f   :  { %v2027_v24 = vsub.f32 %v2019_v17, %v2025_v20 }
 0xca0   :  { %v2022_v26 = vpop.xlane.xlu0 %2021 }
 0xca1   :  { %v2030_v27 = vmul.f32 1.442695, %v2027_v24  ;;  %v2026_v28 = vsub.f32 %v2018_v40, %v2022_v26 }
 0xca3   :  { %3555 = vpow2.f32 %v2030_v27  ;;  %v2028_v30 = vmul.f32 1.442695, %v2026_v28 }
 0xca5   :  { %3557 = vpow2.f32 %v2028_v30 }
 0xcb0   :  { %v3556_v35 = vpop.eup %3555 }
 0xcb1   :  { %v2035_v12 = vsel %vm725_vm0, %v3556_v35, 0.0 }
 0xcb2   :  { %v3558_v52 = vpop.eup %3557  ;;  %2036 = vadd.xlane.f32.xlu1 %v2035_v12 }
 0xcb3   :  { %v2032_v37 = vsel %vm725_vm0, %v3558_v52, 0.0 }
 0xcb4   :  { %2033 = vadd.xlane.f32.xlu0 %v2032_v37  ;;  %v3499_v37 = vld [vmem:[#allocation11 + $0xf8] sm:$0xff]  }
 0xd3b   :  { %v2037_v42 = vpop.xlane.xlu1 %2036 }
 0xd3c   :  { %3559 = vrcp.f32 %v2037_v42  ;;  %v3505_v42 = vld [vmem:[#allocation11 + $0xc8] sm:$0xff]  }
 0xd3d   :  { %v2034_v33 = vpop.xlane.xlu0 %2033 }
 0xd3e   :  { %3561 = vrcp.f32 %v2034_v33  ;;  %v3506_v33 = vld [vmem:[#allocation11 + $0xc0] sm:$0xff]  }
 0xd49   :  { %v3560_v41 = vpop.eup %3559 }
 0xd4a   :  { %v2041_v45 = vmul.f32 %v3560_v41, %v3556_v35 }
 0xd4b   :  { %v3562_v43 = vpop.eup %3561 }
 0xd4c   :  { %v2040_v31 = vmul.f32 %v3562_v43, %v3558_v52 }
 0xd4e   :  { %v2042_v46 = vpack.c.bf16 %v2041_v45, %v2040_v31 }
 0xd50   :  { %3199 = vmatmul.mubr.msk.bf16.vlgmr.msra.gmra.mxu0 %vm725_vm0, %v2042_v46 }
 0xd51   :  { %3203 = vmatpush3.xpose.msra.mxu0 %v1896_v10  ;;  %3206 = vmatprep.mubr.f32.mxu0 %v1849_v48  ;;  %v2964_v48 = vld [vmem:[%s4209_s6 + $0x1] ss:$0 sm:$0xff] }
 0xd52   :  { %3204 = vmatprep.subr.mxu0 %v4099_v6 }
 0xd55   :  { %3205 = vmatpush3.xpose.msra.mxu0 %v4099_v6 }
 0xd56   :  { %3209 = vmatprep.subr.bf16.mxu0 %v3794_v21 }
 0xd58   :  { %3207 = vmatmul.mubr.f32.vlgmr.msra.gmra.mxu0 %v1853_v5 }
 0xd59   :  { %3210 = vmatpush3.bf16.msra.mxu0 %v2208_v56  ;;  %3211 = vmatprep.mubr.msk.bf16.mxu0 %vm3795_vm1, %v3794_v21 }
 0xd5a   :  { %3215 = vmatprep.subr.bf16.mxu0 %v3794_v21 }
 0xe10   :  { %v2081_v47 = vpop.f32.mrf.mxu0 }
 0xe12   :  { %v3200_v6 = vpop.f32.mrf.mxu0 }
 0xe14   :  { %v2084_v58 = vpop.f32.mrf.mxu0 }
 0xe15   :  { %v2088_v59 = vpack.c.bf16 %v2084_v58, %v2081_v47 }
 0xe16   :  { %v3201_v61 = vpop.f32.mrf.mxu0 }
 0xe17   :  { %3252 = vmatmul.mubr.bf16.vlgmr.msra.gmra.mxu1 %v2088_v59  ;;  %v3507_v59 = vld [vmem:[#allocation13 + $0x78] sm:$0xff]   ;;  %v3508_v61 = vld [vmem:[#allocation13 + $0x70] sm:$0xff]  }
 0xe18   :  { %v3208_v62 = vpop.f32.mrf.mxu0  ;;  %3291 = vmatprep.mubr.msk.bf16.mxu1 %vm3795_vm1, %v3794_v21 }
 0xe19   :  { %v2182_v23 = vmul.f32 0.25, %v3208_v62  ;;  %v3509_v62 = vld [vmem:[#allocation13 + $0x68] sm:$0xff]  }
 0xe1a   :  { %v2172_v63 = vpop.f32.mrf.mxu0 }
 0xe1b   :  { %v2181_v25 = vmul.f32 0.25, %v2172_v63  ;;  %v2184_v3 = vadd.f32 %v3583_v2, %v2182_v23  ;;  %v3511_v23 = vld [vmem:[#allocation13 + $0x58] sm:$0xff]   ;;  %v3513_v63 = vld [vmem:[#allocation13 + $0x48] sm:$0xff]  }
 0xe1d   :  { %v2188_v4 = vsel %vm725_vm0, %v2184_v3, -inf  ;;  %v2183_v7 = vadd.f32 %v3584_v0, %v2181_v25  ;;  %v3514_v25 = vld [vmem:[#allocation13 + $0x40] sm:$0xff]  }
 0xe1e   :  { %2189 = vmax.xlane.f32.xlu1 %v2188_v4 }
 0xe1f   :  { %v2185_v8 = vsel %vm725_vm0, %v2183_v7, -inf }
 0xe20   :  { %2186 = vmax.xlane.f32.xlu0 %v2185_v8 }
 0xea7   :  { %v2190_v9 = vpop.xlane.xlu1 %2189 }
 0xea8   :  { %v2192_v1 = vsub.f32 %v2184_v3, %v2190_v9 }
 0xea9   :  { %v2187_v10 = vpop.xlane.xlu0 %2186 }
 0xeaa   :  { %v2195_v11 = vmul.f32 1.442695, %v2192_v1  ;;  %v2191_v13 = vsub.f32 %v2183_v7, %v2187_v10 }
 0xeac   :  { %3563 = vpow2.f32 %v2195_v11  ;;  %v2193_v14 = vmul.f32 1.442695, %v2191_v13 }
 0xeae   :  { %3565 = vpow2.f32 %v2193_v14 }
 0xeb9   :  { %v3564_v15 = vpop.eup %3563 }
 0xeba   :  { %v2200_v17 = vsel %vm725_vm0, %v3564_v15, 0.0 }
 0xebb   :  { %v3566_v18 = vpop.eup %3565  ;;  %2201 = vadd.xlane.f32.xlu1 %v2200_v17 }
 0xebc   :  { %v2197_v40 = vsel %vm725_vm0, %v3566_v18, 0.0 }
 0xebd   :  { %2198 = vadd.xlane.f32.xlu0 %v2197_v40 }
 0xed7   :  { %v2442_v19 = vpop.f32.mrf.mxu1 }
 0xed9   :  { %v3253_v20 = vpop.f32.mrf.mxu1 }
 0xedb   :  { %v2445_v24 = vpop.f32.mrf.mxu1 }
 0xedd   :  { %v3254_v26 = vpop.f32.mrf.mxu1 }
 0xf44   :  { %v2202_v27 = vpop.xlane.xlu1 %2201 }
 0xf45   :  { %3567 = vrcp.f32 %v2202_v27 }
 0xf46   :  { %v2199_v28 = vpop.xlane.xlu0 %2198 }
 0xf47   :  { %3569 = vrcp.f32 %v2199_v28 }
 0xf52   :  { %v3568_v30 = vpop.eup %3567 }
 0xf53   :  { %v2206_v52 = vmul.f32 %v3568_v30, %v3564_v15 }
 0xf54   :  { %v3570_v35 = vpop.eup %3569 }
 0xf55   :  { %v2205_v12 = vmul.f32 %v3570_v35, %v3566_v18  ;;  %v2965_v18 = vld [vmem:[%s4210_s7 + $0x2] sm:$0x3] }
 0xf56   :  { %v2498_v35 = vrot.slane %v2965_v18, %v3926_v60 }
 0xf57   :  { %v2207_v57 = vpack.c.bf16 %v2206_v52, %v2205_v12 }
 0xf59   :  { %3212 = vmatmul.mubr.msk.bf16.vlgmr.msra.gmra.mxu0 %vm725_vm0, %v2207_v57 }
 0xf5a   :  { %3216 = vmatpush3.bf16.msra.mxu0 %v3499_v37  ;;  %3231 = vmatprep.mubr.msk.bf16.mxu0 %vm3795_vm1, %v3794_v21 }
 0xf5b   :  { %3217 = vmatprep.subr.bf16.mxu0 %v3794_v21 }
 0xf5e   :  { %3218 = vmatpush3.bf16.msra.mxu0 %v3500_v38  ;;  %v3515_v38 = vld [vmem:[#allocation14 + $0x78] sm:$0xff]  }
 0xf5f   :  { %3219 = vmatprep.subr.bf16.mxu0 %v3794_v21  ;;  %3276 = vmatpush3.bf16.msra.mxu1 %v3515_v38 }
 0xf60   :  { %3277 = vmatprep.subr.bf16.mxu1 %v3794_v21 }
 0xf62   :  { %3220 = vmatpush3.bf16.msra.mxu0 %v3501_v16  ;;  %v3516_v16 = vld [vmem:[#allocation14 + $0x70] sm:$0xff]  }
 0xf63   :  { %3221 = vmatprep.subr.bf16.mxu0 %v3794_v21  ;;  %3278 = vmatpush3.bf16.msra.mxu1 %v3516_v16 }
 0xf64   :  { %3279 = vmatprep.subr.bf16.mxu1 %v3794_v21 }
 0xf66   :  { %3222 = vmatpush3.bf16.msra.mxu0 %v3502_v39  ;;  %v3517_v39 = vld [vmem:[#allocation14 + $0x68] sm:$0xff]  }
 0xf67   :  { %3223 = vmatprep.subr.bf16.mxu0 %v3794_v21  ;;  %3280 = vmatpush3.bf16.msra.mxu1 %v3517_v39 }
 0xf68   :  { %3281 = vmatprep.subr.bf16.mxu1 %v3794_v21 }
 0xf6a   :  { %3224 = vmatpush3.bf16.msra.mxu0 %v3503_v36  ;;  %v3518_v36 = vld [vmem:[#allocation14 + $0x60] sm:$0xff]  }
 0xf6b   :  { %3225 = vmatprep.subr.bf16.mxu0 %v3794_v21  ;;  %3282 = vmatpush3.bf16.msra.mxu1 %v3518_v36 }
 0xf6c   :  { %3283 = vmatprep.subr.bf16.mxu1 %v3794_v21 }
 0xf6e   :  { %3226 = vmatpush3.bf16.msra.mxu0 %v3504_v22  ;;  %v3519_v22 = vld [vmem:[#allocation14 + $0x58] sm:$0xff]  }
 0xf6f   :  { %3227 = vmatprep.subr.bf16.mxu0 %v3794_v21  ;;  %3284 = vmatpush3.bf16.msra.mxu1 %v3519_v22 }
 0xf70   :  { %3285 = vmatprep.subr.bf16.mxu1 %v3794_v21 }
 0xf72   :  { %3228 = vmatpush3.bf16.msra.mxu0 %v3505_v42  ;;  %v3520_v42 = vld [vmem:[#allocation14 + $0x50] sm:$0xff]  }
 0xf73   :  { %3229 = vmatprep.subr.bf16.mxu0 %v3794_v21  ;;  %3286 = vmatpush3.bf16.msra.mxu1 %v3520_v42 }
 0xf74   :  { %3287 = vmatprep.subr.bf16.mxu1 %v3794_v21 }
 0xf76   :  { %3230 = vmatpush3.bf16.msra.mxu0 %v3506_v33  ;;  %v3521_v33 = vld [vmem:[#allocation14 + $0x48] sm:$0xff]  }
 0xf77   :  { %3255 = vmatprep.subr.bf16.mxu0 %v3794_v21  ;;  %3288 = vmatpush3.bf16.msra.mxu1 %v3521_v33 }
 0xf78   :  { %3289 = vmatprep.subr.bf16.mxu1 %v3794_v21 }
0x1019   :  { %v2246_v41 = vpop.f32.mrf.mxu0 }
0x101b   :  { %v3213_v43 = vpop.f32.mrf.mxu0 }
0x101c   :  { %v2967_v43 = vld [vmem:[%s4212_s9 + $0x1] ss:$0 sm:$0xff] }
0x101d   :  { %v2249_v44 = vpop.f32.mrf.mxu0 }
0x101e   :  { %v2253_v31 = vpack.c.bf16 %v2249_v44, %v2246_v41  ;;  %v3522_v41 = vld [vmem:[#allocation14 + $0x40] sm:$0xff]  }
0x101f   :  { %v3214_v45 = vpop.f32.mrf.mxu0  ;;  %3290 = vmatpush3.bf16.msra.mxu1 %v3522_v41 }
0x1020   :  { %3232 = vmatmul.mubr.bf16.vlgmr.msra.gmra.mxu0 %v2253_v31 }
0x1021   :  { %3271 = vmatprep.mubr.msk.bf16.mxu0 %vm3795_vm1, %v3794_v21  ;;  %3256 = vmatpush3.bf16.msra.mxu0 %v3507_v59 }
0x1022   :  { %3257 = vmatprep.subr.bf16.mxu0 %v3794_v21 }
0x1025   :  { %3258 = vmatpush3.bf16.msra.mxu0 %v3508_v61 }
0x1026   :  { %3259 = vmatprep.subr.bf16.mxu0 %v3794_v21 }
0x1029   :  { %3260 = vmatpush3.bf16.msra.mxu0 %v3509_v62 }
0x102a   :  { %3261 = vmatprep.subr.bf16.mxu0 %v3794_v21 }
0x10e0   :  { %v2353_v46 = vpop.f32.mrf.mxu0 }
0x10e1   :  { %v2443_v49 = vadd.f32 %v2442_v19, %v2353_v46 }
0x10e2   :  { %v3233_v50 = vpop.f32.mrf.mxu0 }
0x10e3   :  { %v2457_v51 = vadd.f32 %v2964_v48, %v2443_v49 }
0x10e4   :  { %v2356_v55 = vpop.f32.mrf.mxu0 }
0x10e5   :  { %v2446_v5 = vadd.f32 %v2445_v24, %v2356_v55  ;;  %v2459_v56 = vadd.f32 %v2457_v51, %v4079_v32  ;;  %v3510_v32 = vld [vmem:[#allocation13 + $0x60] sm:$0xff]   ;;  %v2492_v24 = vrot.slane %v2965_v18, %v3921_v54 }
0x10e6   :  { %v3234_v53 = vpop.f32.mrf.mxu0  ;;  %3262 = vmatpush3.bf16.msra.mxu0 %v3510_v32 }
0x10e7   :  { %v2458_v29 = vadd.f32 %v2964_v48, %v2446_v5  ;;  %2463 = vadd.xlane.f32.xlu0 %v2459_v56  ;;  %v2469_v47 = vmul.f32 %v2459_v56, %v2459_v56  ;;  %3263 = vmatprep.subr.bf16.mxu0 %v3794_v21 }
0x10e9   :  { %v2460_v6 = vadd.f32 %v2458_v29, %v4081_v34  ;;  %v3512_v34 = vld [vmem:[#allocation13 + $0x50] sm:$0xff]  }
0x10ea   :  { %3264 = vmatpush3.bf16.msra.mxu0 %v3511_v23 }
0x10eb   :  { %2471 = vadd.xlane.f32.xlu0 %v2469_v47  ;;  %2465 = vadd.xlane.f32.xlu1 %v2460_v6  ;;  %v2470_v58 = vmul.f32 %v2460_v6, %v2460_v6 }
0x10ec   :  { %3265 = vmatprep.subr.bf16.mxu0 %v3794_v21 }
0x10ee   :  { %3266 = vmatpush3.bf16.msra.mxu0 %v3512_v34 }
0x10ef   :  { %2473 = vadd.xlane.f32.xlu1 %v2470_v58  ;;  %3267 = vmatprep.subr.bf16.mxu0 %v3794_v21 }
0x10f2   :  { %3268 = vmatpush3.bf16.msra.mxu0 %v3513_v63 }
0x10f3   :  { %3269 = vmatprep.subr.bf16.mxu0 %v3794_v21 }
0x10f6   :  { %3270 = vmatpush3.bf16.msra.mxu0 %v3514_v25 }
0x1170   :  { %v2464_v2 = vpop.xlane.xlu0 %2463 }
0x1171   :  { %v2467_v3 = vmul.f32 0.03125, %v2464_v2  ;;  %v2977_v2 = vld [vmem:[%s4214_s11 + $0x1] ss:$0 sm:$0xff] }
0x1173   :  { %v2477_v7 = vmul.f32 %v2467_v3, %v2467_v3  ;;  %v2481_v40 = vsub.f32 %v2459_v56, %v2467_v3 }
0x1174   :  { %v2472_v4 = vpop.xlane.xlu0 %2471  ;;  %v2466_v0 = vpop.xlane.xlu1 %2465 }
0x1175   :  { %v2475_v8 = vmul.f32 0.03125, %v2472_v4  ;;  %v2468_v9 = vmul.f32 0.03125, %v2466_v0 }
0x1177   :  { %v2479_v1 = vsub.f32 %v2475_v8, %v2477_v7  ;;  %v2478_v13 = vmul.f32 %v2468_v9, %v2468_v9  ;;  %v2482_v26 = vsub.f32 %v2460_v6, %v2468_v9 }
0x1178   :  { %v2474_v10 = vpop.xlane.xlu1 %2473 }
0x1179   :  { %v2483_v11 = vadd.f32 1e-12, %v2479_v1  ;;  %v2476_v14 = vmul.f32 0.03125, %v2474_v10 }
0x117b   :  { %3571 = vrsqrt.f32 %v2483_v11  ;;  %v2480_v15 = vsub.f32 %v2476_v14, %v2478_v13 }
0x117d   :  { %v2484_v17 = vadd.f32 1e-12, %v2480_v15 }
0x117f   :  { %3573 = vrsqrt.f32 %v2484_v17 }
0x1188   :  { %v3572_v19 = vpop.eup %3571 }
0x1189   :  { %v2487_v20 = vmul.f32 %v3572_v19, %v2481_v40 }
0x118b   :  { %v2493_v30 = vmul.f32 %v2492_v24, %v2487_v20 }
0x118c   :  { %v3574_v27 = vpop.eup %3573 }
0x118d   :  { %v2488_v28 = vmul.f32 %v3574_v27, %v2482_v26  ;;  %v2499_v52 = vadd.f32 %v2498_v35, %v2493_v30 }
0x118f   :  { %v2494_v12 = vmul.f32 %v2492_v24, %v2488_v28 }
0x1191   :  { %v4178_v37 = vadd.f32 %v2498_v35, %v2494_v12 }
0x1193   :  { %v2501_v57 = vpack.c.bf16 %v4178_v37, %v2499_v52 }
0x1195   :  { %3272 = vmatmul.mubr.bf16.vlgmr.msra.gmra.mxu0 %v2501_v57 }
0x1255   :  { %v2609_v44 = vpop.f32.mrf.mxu0 }
0x1256   :  { %v2610_v31 = vadd.f32 %v2967_v43, %v2609_v44 }
0x1257   :  { %v3273_v45 = vpop.f32.mrf.mxu0 }
0x1258   :  { %v2616_v46 = vmul.f32 %v2610_v31, %v2610_v31 }
0x1259   :  { %v2612_v48 = vpop.f32.mrf.mxu0 }
0x125a   :  { %v2618_v49 = vmul.f32 %v2616_v46, %v2610_v31  ;;  %v2613_v50 = vadd.f32 %v2967_v43, %v2612_v48 }
0x125b   :  { %v3274_v51 = vpop.f32.mrf.mxu0 }
0x125c   :  { %v2620_v55 = vmul.f32 0.044715, %v2618_v49  ;;  %v2617_v5 = vmul.f32 %v2613_v50, %v2613_v50 }
0x125e   :  { %v2622_v56 = vadd.f32 %v2620_v55, %v2610_v31  ;;  %v2619_v53 = vmul.f32 %v2617_v5, %v2613_v50 }
0x1260   :  { %v2624_v29 = vmul.f32 0.7978846, %v2622_v56  ;;  %v2621_v21 = vmul.f32 0.044715, %v2619_v53 }
0x1262   :  { %3575 = vtanh.f32 %v2624_v29  ;;  %v2623_v47 = vadd.f32 %v2621_v21, %v2613_v50 }
0x1264   :  { %v2625_v6 = vmul.f32 0.7978846, %v2623_v47 }
0x1266   :  { %3577 = vtanh.f32 %v2625_v6 }
0x126f   :  { %v3576_v58 = vpop.eup %3575 }
0x1270   :  { %v2628_v59 = vadd.f32 1.0, %v3576_v58 }
0x1272   :  { %v2630_v62 = vmul.f32 0.5, %v2628_v59 }
0x1273   :  { %v3578_v61 = vpop.eup %3577 }
0x1274   :  { %v2629_v32 = vadd.f32 1.0, %v3578_v61  ;;  %v2632_v34 = vmul.f32 %v2630_v62, %v2610_v31 }
0x1276   :  { %v2631_v23 = vmul.f32 0.5, %v2629_v32 }
0x1278   :  { %v2633_v63 = vmul.f32 %v2631_v23, %v2613_v50 }
0x127a   :  { %v2634_v25 = vpack.c.bf16 %v2633_v63, %v2632_v34 }
0x127c   :  { %3292 = vmatmul.mubr.bf16.vlgmr.msra.gmra.mxu1 %v2634_v25 }
0x133c   :  { %v2742_v3 = vpop.f32.mrf.mxu1 }
0x133d   :  { %v2743_v4 = vadd.f32 %v2977_v2, %v2742_v3 }
0x133e   :  { %v3293_v0 = vpop.f32.mrf.mxu1 }
0x133f   :  { %v2749_v7 = vadd.f32 %v2743_v4, %v2499_v52  ;;  %v2986_v52 = vld [vmem:[%s4215_s12 + $0x2] sm:$0x3]  ;;  %s3745_s12 = scalar_lea.vmem %s2800_s3, 32 }
0x1340   :  { %v2745_v8 = vpop.f32.mrf.mxu1  ;;  %v2782_v57 = vrot.slane %v2986_v52, %v3921_v54  ;;  %v2788_v39 = vrot.slane %v2986_v52, %v3926_v60  ;;  %p3746_p12 = scmp.ne.s32.totalorder %s2800_s3, %s3745_s12  ;;  %p3751_p0 = scmp.lt.s32.totalorder %s3745_s12, %s3745_s12 }
0x1341   :  { %v2746_v9 = vadd.f32 %v2977_v2, %v2745_v8  ;;  %2753 = vadd.xlane.f32.xlu0 %v2749_v7  ;;  %v2759_v11 = vmul.f32 %v2749_v7, %v2749_v7 }
0x1342   :  { %v3294_v1 = vpop.f32.mrf.mxu1  ;;  %p3752_p1 = por %p3751_p0, %p3750_p13 }
0x1343   :  { %v2750_v10 = vadd.f32 %v2746_v9, %v4178_v37 }
0x1344   :  { %p3753_p2 = pnand %p3752_p1, %p3746_p12 }
0x1345   :  { %2761 = vadd.xlane.f32.xlu0 %v2759_v11  ;;  %2755 = vadd.xlane.f32.xlu1 %v2750_v10  ;;  %v2760_v13 = vmul.f32 %v2750_v10, %v2750_v10 }
0x1349   :  { %2763 = vadd.xlane.f32.xlu1 %v2760_v13 }
0x13ca   :  { %v2754_v14 = vpop.xlane.xlu0 %2753 }
0x13cb   :  { %v2757_v15 = vmul.f32 0.03125, %v2754_v14 }
0x13cd   :  { %v2767_v40 = vmul.f32 %v2757_v15, %v2757_v15  ;;  %v2771_v37 = vsub.f32 %v2749_v7, %v2757_v15 }
0x13ce   :  { %v2762_v17 = vpop.xlane.xlu0 %2761  ;;  %v2756_v18 = vpop.xlane.xlu1 %2755 }
0x13cf   :  { %v2765_v19 = vmul.f32 0.03125, %v2762_v17  ;;  %v2758_v20 = vmul.f32 0.03125, %v2756_v18 }
0x13d1   :  { %v2769_v24 = vsub.f32 %v2765_v19, %v2767_v40  ;;  %v2768_v28 = vmul.f32 %v2758_v20, %v2758_v20  ;;  %v2772_v36 = vsub.f32 %v2750_v10, %v2758_v20 }
0x13d2   :  { %v2764_v26 = vpop.xlane.xlu1 %2763 }
0x13d3   :  { %v2773_v27 = vadd.f32 1e-12, %v2769_v24  ;;  %v2766_v30 = vmul.f32 0.03125, %v2764_v26 }
0x13d5   :  { %3579 = vrsqrt.f32 %v2773_v27  ;;  %v2770_v35 = vsub.f32 %v2766_v30, %v2768_v28 }
0x13d7   :  { %v2774_v12 = vadd.f32 1e-12, %v2770_v35 }
0x13d9   :  { %3581 = vrsqrt.f32 %v2774_v12 }
0x13e2   :  { %v3580_v38 = vpop.eup %3579 }
0x13e3   :  { %v2777_v16 = vmul.f32 %v3580_v38, %v2771_v37 }
0x13e5   :  { %v2783_v22 = vmul.f32 %v2782_v57, %v2777_v16 }
0x13e6   :  { %v3582_v42 = vpop.eup %3581 }
0x13e7   :  { %v2778_v33 = vmul.f32 %v3582_v42, %v2772_v36  ;;  %v2789_v41 = vadd.f32 %v2788_v39, %v2783_v22 }
0x13e9   :  { %v2784_v43 = vmul.f32 %v2782_v57, %v2778_v33  ;;  %2791 = vst [vmem:[#allocation16] sm:$0x1] %v2789_v41 }
0x13eb   :  { %v2790_v44 = vadd.f32 %v2788_v39, %v2784_v43 }
0x13ed   :  { %2792 = vst [vmem:[#allocation16 + $0x1] sm:$0x1] %v2790_v44 }
0x13ee   :  { %3756 = shalt.err (!%p3753_p2)
}
0x13ef   :  { %2802 = dma.vmem_to_hbm [thread:$0]  %s2800_s3, 32, %s4216_s13, [#allocation4]  }
0x13f0   :  { %3775 = dma.done.wait [#allocation4], 32  }
0x13f1   :  { %3776 = vsyncadd [#allocation4], 4294967264 }
0x13f2   :  { %2806 = vsyncpa [#allocation3], 1 }
0x13f3   :  { %2807 = vsyncpa [#allocation6], 1 }
0x13f4   :  { %2808 = vsyncpa [#allocation9], 1 }
0x13f5   :  { %2809 = vsyncpa [#allocation12], 1 }
0x13f6   :  { %2810 = vsyncpa [#allocation15], 1 }
0x13f7   :  { %2811 = vsyncpa [#allocation4], 1 }

</bundles_post_ra>
